<compile_context>
chip_gen: v7x
topology: tpu7x:2x2x1
jax: 0.10.0
libtpu: 0.0.40
codegen_flags: <defaults>
</compile_context>

<pallas_src>
import functools
import math

import jax
import jax.numpy as jnp
from jax import lax
from jax.experimental import pallas as pl
from jax.experimental.pallas import tpu as pltpu


# ----------------------------------------------------------------------------
# Pallas kernels
# ----------------------------------------------------------------------------
def linear_kernel(x_ref, w_ref, b_ref, o_ref):
    """One (tm, tn) output tile of x @ W^T + b, full-K contraction per tile.

    x: (tm, K)   w: (tn, K)  (nn.Linear weight layout, NT contraction)
    b: (1, tn)   o: (tm, tn)
    MXU operands are cast to bf16 in-kernel (free VPU filler); accumulation f32.
    """
    x = x_ref[...].astype(jnp.bfloat16)
    w = w_ref[...].astype(jnp.bfloat16)
    acc = lax.dot_general(
        x, w,
        dimension_numbers=(((1,), (1,)), ((), ())),
        preferred_element_type=jnp.float32,
    )
    o_ref[...] = (acc + b_ref[...]).astype(o_ref.dtype)


def flash_attention_kernel(q_ref, k_ref, v_ref, o_ref, m_scr, l_scr, acc_scr,
                           *, sm_scale, block_q, block_kv, causal):
    """Online-softmax attention for one (batch, head, q-tile) over kv tiles.

    q: (1, tq, d_k)  k/v: (1, tkv, d_k)  o: (1, tq, d_k)
    Scratch: m (tq,1), l (tq,1), acc (tq,d_k), all f32 — persist across the
    kv grid axis (innermost, "arbitrary").
    Causal mask is generated in-kernel from iota; no mask tensor is DMA'd.
    """
    qi = pl.program_id(2)
    kvi = pl.program_id(3)

    @pl.when(kvi == 0)
    def _():
        m_scr[...] = jnp.full_like(m_scr, -jnp.inf)
        l_scr[...] = jnp.zeros_like(l_scr)
        acc_scr[...] = jnp.zeros_like(acc_scr)

    def compute():
        q = q_ref[0]        # (tq, d_k)  bf16
        k = k_ref[0]        # (tkv, d_k) bf16
        v = v_ref[0]        # (tkv, d_k) bf16

        # scores = (Q @ K^T) / sqrt(d_k): NT contraction, bf16 MXU, f32 acc.
        s = lax.dot_general(
            q, k, dimension_numbers=(((1,), (1,)), ((), ())),
            preferred_element_type=jnp.float32,
        ) * sm_scale

        if causal:
            row = qi * block_q + lax.broadcasted_iota(
                jnp.int32, (block_q, block_kv), 0)
            col = kvi * block_kv + lax.broadcasted_iota(
                jnp.int32, (block_q, block_kv), 1)
            s = jnp.where(row >= col, s, jnp.float32(-1e9))

        # Online softmax update (f32 VPU math; bf16 only at the MXU inputs).
        m_prev = m_scr[...]
        m_new = jnp.maximum(m_prev, jnp.max(s, axis=-1, keepdims=True))
        alpha = jnp.exp(m_prev - m_new)
        p = jnp.exp(s - m_new)
        l_scr[...] = alpha * l_scr[...] + jnp.sum(p, axis=-1, keepdims=True)
        acc_scr[...] = alpha * acc_scr[...] + jnp.dot(
            p.astype(jnp.bfloat16), v, preferred_element_type=jnp.float32)
        m_scr[...] = m_new

    if causal:
        # Skip kv tiles that lie entirely above the diagonal (fully masked).
        pl.when(kvi * block_kv <= qi * block_q + (block_q - 1))(compute)
    else:
        compute()

    @pl.when(kvi == pl.num_programs(3) - 1)
    def _():
        # Exact divide: runs once per q-tile, negligible cost, tight numerics.
        o_ref[0] = (acc_scr[...] / l_scr[...]).astype(o_ref.dtype)


# ----------------------------------------------------------------------------
# Wrappers
# ----------------------------------------------------------------------------
def linear(x2d, w, b, *, out_dtype=jnp.float32, tm=256, tn=512):
    """x2d: (M, K), w: (N, K), b: (N,) -> (M, N) in out_dtype.

    Single-pass contraction: the full K dimension lives in each tile (no
    K-reduction grid axis, no accumulator scratch).  Fine for transformer
    d_model sizes; tiles stay well under the scoped VMEM limit.
    """
    M, K = x2d.shape
    N = w.shape[0]
    tm, tn = min(tm, M), min(tn, N)
    assert M % tm == 0 and N % tn == 0

    return pl.pallas_call(
        linear_kernel,
        out_shape=jax.ShapeDtypeStruct((M, N), out_dtype),
        grid=(M // tm, N // tn),
        in_specs=[
            pl.BlockSpec((tm, K), lambda i, j: (i, 0)),
            pl.BlockSpec((tn, K), lambda i, j: (j, 0)),
            pl.BlockSpec((1, tn), lambda i, j: (0, j)),
        ],
        out_specs=pl.BlockSpec((tm, tn), lambda i, j: (i, j)),
        compiler_params=pltpu.CompilerParams(
            dimension_semantics=("parallel", "parallel"),
            vmem_limit_bytes=32 * 1024 * 1024,  # re-budget per generation
        ),
    )(x2d, w, b.reshape(1, N))


def flash_attention(q, k, v, *, h, d_model, q_off=0, k_off=0, v_off=0,
                    causal=True, tq=256, tkv=256, out_dtype=jnp.bfloat16):
    """q/k/v: (B, S, *) with heads packed d_k-wide along the last dim.

    q_off/k_off/v_off are head-block offsets along the last dim, so a fused
    (B, S, 3*d_model) QKV buffer can be passed three times with offsets
    (0, h, 2h) — no split/copy is materialized.  Returns (B, S, d_model).
    """
    B, S, _ = q.shape
    d_k = d_model // h
    tq, tkv = min(tq, S), min(tkv, S)
    assert S % tq == 0 and S % tkv == 0

    kernel = functools.partial(
        flash_attention_kernel,
        sm_scale=1.0 / math.sqrt(d_k),
        block_q=tq, block_kv=tkv, causal=causal)

    return pl.pallas_call(
        kernel,
        out_shape=jax.ShapeDtypeStruct((B, S, d_model), out_dtype),
        grid=(B, h, S // tq, S // tkv),
        in_specs=[
            pl.BlockSpec((1, tq, d_k), lambda b, hh, qi, ki: (b, qi, q_off + hh)),
            pl.BlockSpec((1, tkv, d_k), lambda b, hh, qi, ki: (b, ki, k_off + hh)),
            pl.BlockSpec((1, tkv, d_k), lambda b, hh, qi, ki: (b, ki, v_off + hh)),
        ],
        out_specs=pl.BlockSpec((1, tq, d_k), lambda b, hh, qi, ki: (b, qi, hh)),
        scratch_shapes=[
            pltpu.VMEM((tq, 1), jnp.float32),    # running max m
            pltpu.VMEM((tq, 1), jnp.float32),    # running denom l
            pltpu.VMEM((tq, d_k), jnp.float32),  # output accumulator
        ],
        compiler_params=pltpu.CompilerParams(
            dimension_semantics=("parallel", "parallel", "parallel", "arbitrary"),
            vmem_limit_bytes=32 * 1024 * 1024,
        ),
    )(q, k, v)


def multi_headed_attention(params, query, key, value, h, *, causal=True):
    """Forward pass matching PyTorch MultiHeadedAttention.forward (eval mode,
    causal 0/1 mask)."""
    B, S, D = query.shape
    (wq, bq), (wk, bk), (wv, bv), (wo, bo) = params

    if (query is key) and (key is value):
        # Fused QKV projection: one pallas_call, activation read from HBM once.
        w_qkv = jnp.concatenate([wq, wk, wv], axis=0)   # (3D, D)
        b_qkv = jnp.concatenate([bq, bk, bv], axis=0)   # (3D,)
        qkv = linear(query.reshape(B * S, D), w_qkv, b_qkv,
                     out_dtype=jnp.bfloat16).reshape(B, S, 3 * D)
        ctx = flash_attention(qkv, qkv, qkv, h=h, d_model=D,
                              q_off=0, k_off=h, v_off=2 * h, causal=causal)
    else:
        def project(x, w, b):
            return linear(x.reshape(B * S, D), w, b,
                          out_dtype=jnp.bfloat16).reshape(B, S, D)
        q = project(query, wq, bq)
        k = project(key, wk, bk)
        v = project(value, wv, bv)
        ctx = flash_attention(q, k, v, h=h, d_model=D, causal=causal)

    out = linear(ctx.reshape(B * S, D), wo, bo,
                 out_dtype=jnp.float32).reshape(B, S, D)
    return out


# ----------------------------------------------------------------------------
# Pure-JAX reference (silent correctness check)
# ----------------------------------------------------------------------------
def reference(params, query, key, value, mask, h):
    B, S, D = query.shape
    d_k = D // h
    (wq, bq), (wk, bk), (wv, bv), (wo, bo) = params

    def proj(x, w, b):
        y = x @ w.T + b
        return y.reshape(B, S, h, d_k).transpose(0, 2, 1, 3)

    q, k, v = proj(query, wq, bq), proj(key, wk, bk), proj(value, wv, bv)
    scores = jnp.einsum("bhqd,bhkd->bhqk", q, k) / math.sqrt(d_k)
    scores = jnp.where(mask[:, None, :, :] == 0, -1e9, scores)
    p = jax.nn.softmax(scores, axis=-1)
    x = jnp.einsum("bhqk,bhkd->bhqd", p, v)
    x = x.transpose(0, 2, 1, 3).reshape(B, S, D)
    return x @ wo.T + bo


# ----------------------------------------------------------------------------
if __name__ == "__main__":
    # Shapes chosen so head slices are lane-dense (d_k=128).
    B, S, D, H = 2, 256, 512, 4   # d_k = 128

    key0 = jax.random.PRNGKey(0)
    keys = jax.random.split(key0, 12)

    # Deterministic parameter init (nn.Linear(d_model, d_model) x 4).
    def make_linear(kw, kb):
        bound = 1.0 / math.sqrt(D)
        w = jax.random.uniform(kw, (D, D), jnp.float32, -bound, bound)
        b = jax.random.uniform(kb, (D,), jnp.float32, -bound, bound)
        return w, b

    params = tuple(make_linear(keys[2 * i], keys[2 * i + 1]) for i in range(4))

    # Self-attention (standard use of this module): q = k = v = x.
    x = jax.random.normal(keys[8], (B, S, D), jnp.float32)
    # Causal 0/1 mask — used by the reference only; the kernel builds the
    # causal mask in-kernel from iota (no mask tensor DMA).
    mask = jnp.broadcast_to(
        jnp.tril(jnp.ones((S, S), jnp.int32))[None, :, :], (B, S, S))

    out = multi_headed_attention(params, x, x, x, H, causal=True)
    out = jax.block_until_ready(out)

    ref = reference(params, x, x, x, mask, H)
    assert out.shape == (B, S, D)
    # Tolerance sized for bf16 MXU operands through three matmul stages
    # (f32 accumulation throughout); reference is full f32.
    assert jnp.allclose(out, ref, atol=3e-2, rtol=3e-2), "mismatch vs reference"

    print("KERNEL_OK")
</pallas_src>

<mosaic_0001>
module attributes {stable_mosaic.version = 11 : i64} {
  func.func @linear_kernel(%arg0: i32, %arg1: i32, %arg2: memref<256x512xf32, #tpu.memory_space<vmem>>, %arg3: memref<512x512xf32, #tpu.memory_space<vmem>>, %arg4: memref<1x512xf32, #tpu.memory_space<vmem>>, %arg5: memref<256x512xbf16, #tpu.memory_space<vmem>>) attributes {dimension_semantics = [#tpu.dimension_semantics<parallel>, #tpu.dimension_semantics<parallel>], iteration_bounds = array<i64: 2, 3>, scalar_prefetch = 0 : i64, scratch_operands = 0 : i64, tpu.core_type = #tpu.core_type<tc>, window_params = [{transform_indices = @transform_0, window_bounds = array<i64: 256, 512>}, {transform_indices = @transform_1, window_bounds = array<i64: 512, 512>}, {transform_indices = @transform_2, window_bounds = array<i64: 1, 512>}, {transform_indices = @transform_3, window_bounds = array<i64: 256, 512>}]} {
    %c0 = arith.constant 0 : index
    %c0_0 = arith.constant 0 : index
    %0 = vector.load %arg2[%c0, %c0_0] : memref<256x512xf32, #tpu.memory_space<vmem>>, vector<256x512xf32>
    %1 = arith.truncf %0 : vector<256x512xf32> to vector<256x512xbf16>
    %c0_1 = arith.constant 0 : index
    %c0_2 = arith.constant 0 : index
    %2 = vector.load %arg3[%c0_1, %c0_2] : memref<512x512xf32, #tpu.memory_space<vmem>>, vector<512x512xf32>
    %3 = arith.truncf %2 : vector<512x512xf32> to vector<512x512xbf16>
    %cst = arith.constant dense<0.000000e+00> : vector<256x512xf32>
    %4 = tpu.matmul %1, %3, %cst {dimension_numbers = #tpu.dot_dimension_numbers<[1], [1], [0], [0], [0, 0, 1, 0], [], []>} : vector<256x512xbf16>, vector<512x512xbf16>, vector<256x512xf32> -> vector<256x512xf32>
    %c0_3 = arith.constant 0 : index
    %c0_4 = arith.constant 0 : index
    %5 = vector.load %arg4[%c0_3, %c0_4] : memref<1x512xf32, #tpu.memory_space<vmem>>, vector<1x512xf32>
    %6 = vector.broadcast %5 : vector<1x512xf32> to vector<256x512xf32>
    %7 = arith.addf %4, %6 : vector<256x512xf32>
    %8 = arith.truncf %7 : vector<256x512xf32> to vector<256x512xbf16>
    %c0_5 = arith.constant 0 : index
    %c0_6 = arith.constant 0 : index
    %9 = vector.load %arg5[%c0_5, %c0_6] : memref<256x512xbf16, #tpu.memory_space<vmem>>, vector<256x512xbf16>
    tpu.vector_store %arg5[%c0_5, %c0_6], %8 {strides = array<i32>} : memref<256x512xbf16, #tpu.memory_space<vmem>>, vector<256x512xbf16>,
    return
  }
  func.func @transform_0(%arg0: i32, %arg1: i32) -> (i32, i32) {
    %c0_i32 = arith.constant 0 : i32
    %c0_i32_0 = arith.constant 0 : i32
    return %arg0, %c0_i32 : i32, i32
  }
  func.func @transform_1(%arg0: i32, %arg1: i32) -> (i32, i32) {
    %c0_i32 = arith.constant 0 : i32
    %c0_i32_0 = arith.constant 0 : i32
    return %arg1, %c0_i32 : i32, i32
  }
  func.func @transform_2(%arg0: i32, %arg1: i32) -> (i32, i32) {
    %c0_i32 = arith.constant 0 : i32
    %c0_i32_0 = arith.constant 0 : i32
    return %c0_i32, %arg1 : i32, i32
  }
  func.func @transform_3(%arg0: i32, %arg1: i32) -> (i32, i32) {
    %c0_i32 = arith.constant 0 : i32
    return %arg0, %arg1 : i32, i32
  }
}

</mosaic_0001>

<bundles_post_ra>
// kernel: tpu_custom_call.1
= control target key start
LH: loop header
LB: loop body
LE: loop exit
PB: predicated region body
PF: predicated region fallthrough
CT: control target
= control target key end

     0   :  { %s4069_s0 = inlined_call_operand.hbm [shape: f32[512,512], index: 0, kind: input, shape index: {}]   ;;  %s4070_s1 = inlined_call_operand.hbm [shape: f32[1536,512], index: 1, kind: input, shape index: {}]   ;;  %s4071_s2 = inlined_call_operand.hbm [shape: f32[1,1536], index: 2, kind: input, shape index: {}]   ;;  %s4072_s3 = inlined_call_operand.hbm [shape: bf16[512,1536], index: 3, kind: output, shape index: {}]  }
   0x1   :  { %4091 = sst [smem:[#allocation22_spill]] %s4070_s1 }
   0x2   :  { %4092 = sst [smem:[#allocation23_spill]] %s4072_s3 }
   0x3   :  { %8 = vsyncpa [#allocation3], 0 }
   0x4   :  { %10 = vsyncpa [#allocation3 + $0x1], 0 }
   0x5   :  { %11 = vsyncpa [#allocation6], 0 }
   0x6   :  { %13 = vsyncpa [#allocation6 + $0x1], 0 }
   0x7   :  { %14 = vsyncpa [#allocation4], 0 }
   0x8   :  { %16 = vsyncpa [#allocation4 + $0x1], 0  ;;  %s3079_s12 = smov 0   ;;  %s3081_s13 = smov 0  }
   0x9   :  { %s3083_s14 = smov 0   ;;  %s3085_s15 = smov 0  }
   0xa   :  { %s3087_s16 = smov 0   ;;  %s3089_s17 = smov 0  }
   0xb   :  { %s3091_s18 = smov 0   ;;  %s3093_s19 = smov 0  }
   0xc   :  { %s3095_s20 = smov 0   ;;  %s3097_s21 = smov 0  }
   0xd   :  { %s3099_s22 = smov 0   ;;  %s3101_s23 = smov 0  }
   0xe   :  { %s3103_s24 = smov 0   ;;  %s3105_s25 = smov 0  }
   0xf LB: > { %4093 = sst [smem:[#allocation12_spill]] %s2996_s12  ;;  %s3148_s26 = sadd.s32 4294967295, %s3048_s25   ;;  %s3048_s25 = sphi %s3105_s25, %s22_s25   ;;  %s3044_s24 = sphi %s3103_s24, %s4141_s24   ;;  %s3040_s23 = sphi %s3101_s23, %s4150_s23   ;;  %s3036_s22 = sphi %s3099_s22, %s4139_s22   ;;  %s3032_s21 = sphi %s3097_s21, %s4149_s21   ;;  %s3028_s20 = sphi %s3095_s20, %s4138_s20   ;;  %s3024_s19 = sphi %s3093_s19, %s4148_s19   ;;  %s3020_s18 = sphi %s3091_s18, %s4147_s18   ;;  %s3016_s17 = sphi %s3089_s17, %s4146_s17   ;;  %s3012_s16 = sphi %s3087_s16, %s4145_s16   ;;  %s3008_s15 = sphi %s3085_s15, %s4144_s15   ;;  %s3004_s14 = sphi %s3083_s14, %s4143_s14   ;;  %s3000_s13 = sphi %s3081_s13, %s4142_s13   ;;  %s2996_s12 = sphi %s3079_s12, %s4135_s12  }
  0x10   : > { %4094 = sst [smem:[#allocation13_spill]] %s3000_s13  ;;  %s31_s27 = sadd.s32 1, %s3040_s23 }
  0x11   : > { %4095 = sst [smem:[#allocation14_spill]] %s3028_s20  ;;  %p3151_p0 = scmp.ge.s32.totalorder %s31_s27, 3 }
  0x12   : > { %4096 = sst [smem:[#allocation15_spill]] %s3032_s21  ;;  %p4078_p1 = scmp.eq.s32.totalorder %s3048_s25, 0 }
  0x13   : > { %4097 = sst [smem:[#allocation16_spill]] %s3036_s22  ;;  %p4077_p2 = scmp.eq.s32.totalorder %s3148_s26, 0 }
  0x14   : > { %4098 = sst [smem:[#allocation17_spill]] %s3044_s24  ;;  %s67_s29 = sadd.s32 1, %s3016_s17 }
  0x15   : > { %s4152_s27 = smov (%p3151_p0, %s31_s27), 0  ;;  %p74_p3 = scmp.ne.s32.totalorder %s3016_s17, %s3012_s16 }
  0x16   : > { %4100 = sst [smem:[#allocation18_spill]] %s4152_s27  ;;  %p80_p4 = scmp.ne.s32.totalorder %s3012_s16, %s3008_s15 }
  0x17   : > { %s3167_s30 = ssub.s32 %s3040_s23, %s4152_s27  ;;  %p76_p7 = por %p74_p3, %p4078_p1 }
  0x18   : > { %p65_p6 = scmp.eq.s32.totalorder %s3167_s30, 0  ;;  %p3175_p8 = por %p80_p4, %p4077_p2 }
  0x19   : > { %p4076_p9 = scmp.lt.s32.totalorder %s3048_s25, 6  ;;  %s180_s6 = sand.u32 1, %s3048_s25  }
  0x1a   : > { %s4101_s4 = scalar_select %p3175_p8, 1, 0 }
  0x1b   : > { %s3180_s5 = scalar_select %p65_p6, %s3016_s17, %s67_s29  }
  0x1c   : > { %s4075_s7 = sand.u32 1, %s3016_s17   ;;  %s2344_s9 = sshll.u32 %s3040_s23, 15 }
  0x1d   : > { %4102 = sst [smem:[#allocation19_spill]] %s3180_s5  ;;  %s2258_s8 = sshll.u32 %s4075_s7, 11 }
  0x1e   : > { %s4103_s1 = sld [smem:[#allocation22_spill]]  ;;  %s184_s27 = scalar_lea.vmem [#allocation5], %s2258_s8 }
  0x1f   : > { %s192_s3 = sshll.u32 %s184_s27, 4  ;;  %p3195_p10 = pnand %p4076_p9, %p76_p7  ;;  %s3199_s3 = int_to_ptr.vmem [resolvable:$true] %s192_s3 }
  0x20   : > { %s3203_s10 = scalar_lea.sflag [#allocation6], %s180_s6 }
  0x21   : > { %p4080_p3 = pneg %p3195_p10 }
  0x24   : > { %s3191_s15 = scalar_lea.hbm %s4103_s1, %s2344_s9  ;;  %s2813_s11 = scalar_lea.hbm %s4103_s1, 98304 }
  0x25   : > { %s2808_s9 = scalar_lea.hbm %s3191_s15, 32768  ;;  %p2814_p7 = scmp.lt.u32.totalorder %s3191_s15, %s4103_s1 }
  0x26   : > { %p2809_p13 = scmp.ne.s32.totalorder %s3191_s15, %s2808_s9  ;;  %p2815_p9 = scmp.lt.u32.totalorder %s2813_s11, %s2808_s9 }
  0x27   : > { %p2817_p2 = scmp.lt.u32.totalorder %s2808_s9, %s3191_s15 }
  0x28   : > { %p2811_p4 = pnand %p4080_p3, %p2809_p13  ;;  %p2816_p5 = por %p2815_p9, %p2814_p7 }
  0x2a   : > { %p2812_p6 = pneg %p2811_p4  ;;  %p2818_p1 = por %p2817_p2, %p2816_p5 }
  0x2c   : > { %p2819_p11 = pnand %p2818_p1, %p2812_p6 }
  0x2e   : > { %2822 = shalt.err (!%p2819_p11)
}
  0x2f   : > { %s2823_s6 = scalar_lea.vmem %s3199_s3, 32768  ;;  %s3050_s27 = smov [#allocation5]  }
  0x30   : > { %p2824_p13 = scmp.ne.s32.totalorder %s3199_s3, %s2823_s6  ;;  %s2828_s8 = sshll.u32 %s3050_s27, 4  ;;  %s2829_s8 = int_to_ptr.vmem [resolvable:$false] %s2828_s8 }
  0x31   : > { %s2830_s5 = scalar_lea.vmem %s2829_s8, 65536  ;;  %p2831_p8 = scmp.lt.s32.totalorder %s3199_s3, %s2829_s8 }
  0x32   : > { %p2826_p4 = pnand %p2824_p13, %p4080_p3  ;;  %p2832_p9 = scmp.lt.s32.totalorder %s2830_s5, %s2823_s6 }
  0x34   : > { %p2827_p12 = pneg %p2826_p4  ;;  %p2833_p7 = por %p2832_p9, %p2831_p8 }
  0x36   : > { %p2834_p2 = pnand %p2833_p7, %p2827_p12 }
  0x38   : > { %2837 = shalt.err (!%p2834_p2)
}
  0x39   : > { %s4081_s7 = smov 512   ;;  %s4082_s9 = smov 32  }
  0x3a   : > { %2681 = dma.hbm_to_vmem [thread:$0]  (!%p3195_p10), %s3191_s15, 32768, %s3199_s3, %s3203_s10, %s4081_s7, %s4081_s7, %s4082_s9  }
  0x3b   : > { %p4105_p1 = scmp.lt.s32.totalorder %s3048_s25, 7  ;;  %p4106_p5 = scmp.ge.s32.totalorder %s3048_s25, 1 }
  0x3c   : > { %s2251_s6 = sadd.s32 4294967294, %s3048_s25   ;;  %s34_s27 = sadd.s32 1, %s3044_s24 }
  0x3d   : > { %p3238_p8 = pnand %p4106_p5, %p4105_p1  ;;  %s41_s8 = sadd.s32 1, %s3028_s20 }
  0x3e   : > { %s4154_s27 = smov (!%p3151_p0, %s34_s27), %s3044_s24  ;;  %p48_p11 = scmp.ne.s32.totalorder %s3028_s20, %s3024_s19 }
  0x3f   : > { %s4107_s11 = scalar_select %p3238_p8, 1, 0 }
  0x40   : > { %p54_p12 = scmp.ne.s32.totalorder %s3024_s19, %s3020_s18  ;;  %p36_p6 = scmp.ge.s32.totalorder %s4154_s27, 2 }
  0x41   : > { %s121_s3 = sadd.s32 1, %s3004_s14  ;;  %p4108_p13 = scmp.eq.s32.totalorder %s3048_s25, 0 }
  0x42   : > { %p4110_p9 = scmp.eq.s32.totalorder %s3148_s26, 0  ;;  %s4156_s27 = smov (%p36_p6, %s4154_s27), 0 }
  0x43   : > { %p3255_p4 = por %p4108_p13, %p48_p11  ;;  %4112 = sst [smem:[#allocation20_spill]] %s4156_s27 }
  0x44   : > { %p3261_p7 = por %p4110_p9, %p54_p12  ;;  %p131_p0 = scmp.ne.s32.totalorder %s3004_s14, %s3000_s13 }
  0x45   : > { %p137_p2 = scmp.ne.s32.totalorder %s3000_s13, %s2996_s12  ;;  %s38_s18 = ssub.s32 %s3044_s24, %s4156_s27 }
  0x46   : > { %s4111_s5 = scalar_select %p3261_p7, 1, 0 }
  0x47   : > { %p138_p1 = scmp.eq.s32.totalorder %s2251_s6, 5  ;;  %p39_p5 = scmp.eq.s32.totalorder %s38_s18, 0 }
  0x48   : > { %s118_s28 = sor.u32 %s3167_s30, %s38_s18  ;;  %p4113_p13 = scmp.eq.s32.totalorder %s3148_s26, 5 }
  0x49   : > { %p119_p11 = scmp.eq.s32.totalorder %s118_s28, 0  ;;  %p3286_p12 = por %p138_p1, %p137_p2 }
  0x4a   : > { %p3276_p3 = por %p4113_p13, %p131_p0  ;;  %s158_s27 = sand.u32 1, %s3028_s20  }
  0x4b   : > { %s3281_s9 = scalar_select %p39_p5, %s3028_s20, %s41_s8  }
  0x4c   : > { %s4114_s7 = scalar_select %p3276_p3, 1, 0 }
  0x4d   : > { %4115 = sst [smem:[#allocation21_spill]] %s3281_s9  ;;  %s2254_s6 = sshll.u32 %s158_s27, 10 }
  0x4e   : > { %s3284_s1 = scalar_select %p119_p11, %s3004_s14, %s121_s3  }
  0x4f   : > { %s4116_s12 = scalar_select %p3286_p12, 1, 0 }
  0x50   : > { %s2342_s21 = sshll.u32 %s3044_s24, 14  ;;  %s162_s18 = scalar_lea.vmem [#allocation2], %s2254_s6 }
  0x51   : > { %s3295_s30 = scalar_lea.hbm %s4069_s0, %s2342_s21  ;;  %s170_s8 = sshll.u32 %s162_s18, 4  ;;  %s3297_s8 = int_to_ptr.vmem [resolvable:$true] %s170_s8 }
  0x52   : > { %p4117_p6 = scmp.lt.s32.totalorder %s3048_s25, 6  ;;  %s4119_s28 = sand.u32 1, %s3016_s17  }
  0x53   : > { %s3309_s13 = sshll.u32 %s4119_s28, 2  ;;  %s2345_s21 = sshll.u32 %s3040_s23, 6 }
  0x54   : > { %p3303_p9 = pnand %p4117_p6, %p3255_p4  ;;  %s3312_s22 = scalar_lea.sflag [#allocation3], %s158_s27 }
  0x55   : > { %s2838_s24 = scalar_lea.hbm %s3295_s30, 16384  ;;  %s2843_s18 = scalar_lea.hbm %s4069_s0, 32768 }
  0x56   : > { %p2839_p0 = scmp.ne.s32.totalorder %s3295_s30, %s2838_s24  ;;  %p2840_p2 = pneg %p3303_p9 }
  0x57   : > { %p2844_p4 = scmp.lt.u32.totalorder %s3295_s30, %s4069_s0  ;;  %p2845_p11 = scmp.lt.u32.totalorder %s2843_s18, %s2838_s24 }
  0x58   : > { %p2841_p1 = pnand %p2840_p2, %p2839_p0  ;;  %p2847_p6 = scmp.lt.u32.totalorder %s2838_s24, %s3295_s30 }
  0x59   : > { %p2846_p13 = por %p2845_p11, %p2844_p4 }
  0x5a   : > { %p2842_p5 = pneg %p2841_p1 }
  0x5b   : > { %p2848_p12 = por %p2847_p6, %p2846_p13 }
  0x5d   : > { %p2849_p3 = pnand %p2848_p12, %p2842_p5 }
  0x5f   : > { %2852 = shalt.err (!%p2849_p3)
}
  0x60   : > { %s2853_s27 = scalar_lea.vmem %s3297_s8, 16384  ;;  %s3053_s28 = smov [#allocation2]  }
  0x61   : > { %p2854_p0 = scmp.ne.s32.totalorder %s3297_s8, %s2853_s27  ;;  %s2858_s15 = sshll.u32 %s3053_s28, 4  ;;  %s2859_s15 = int_to_ptr.vmem [resolvable:$false] %s2858_s15 }
  0x62   : > { %s2860_s20 = scalar_lea.vmem %s2859_s15, 32768  ;;  %p2861_p8 = scmp.lt.s32.totalorder %s3297_s8, %s2859_s15 }
  0x63   : > { %p2856_p1 = pnand %p2854_p0, %p2840_p2  ;;  %p2862_p4 = scmp.lt.s32.totalorder %s2860_s20, %s2853_s27 }
  0x65   : > { %p2857_p7 = pneg %p2856_p1  ;;  %p2863_p11 = por %p2862_p4, %p2861_p8 }
  0x67   : > { %p2864_p13 = pnand %p2863_p11, %p2857_p7 }
  0x69   : > { %2867 = shalt.err (!%p2864_p13)
}
  0x6a   : > { %s4120_s24 = smov 32   ;;  %s4121_s9 = smov 512  }
  0x6b   : > { %2678 = dma.hbm_to_vmem [thread:$0]  (!%p3303_p9), %s3295_s30, 16384, %s3297_s8, %s3312_s22, %s4121_s9, %s4121_s9, %s4120_s24  }
  0x6c   : > { %s3348_s27 = scalar_lea.hbm %s4071_s2, %s2345_s21  ;;  %s206_s3 = scalar_lea.vmem [#allocation7], %s3309_s13 }
  0x6d   : > { %s214_s28 = sshll.u32 %s206_s3, 4  ;;  %s2868_s15 = scalar_lea.hbm %s3348_s27, 64  ;;  %s215_s28 = int_to_ptr.vmem [resolvable:$true] %s214_s28 }
  0x6e   : > { %p2869_p3 = scmp.ne.s32.totalorder %s3348_s27, %s2868_s15  ;;  %p4122_p8 = pneg %p3195_p10 }
  0x6f   : > { %s2873_s22 = scalar_lea.hbm %s4071_s2, 192  ;;  %p2874_p9 = scmp.lt.u32.totalorder %s3348_s27, %s4071_s2 }
  0x70   : > { %p2871_p7 = pnand %p2869_p3, %p4122_p8  ;;  %p2875_p2 = scmp.lt.u32.totalorder %s2873_s22, %s2868_s15 }
  0x71   : > { %p2877_p6 = scmp.lt.u32.totalorder %s2868_s15, %s3348_s27 }
  0x72   : > { %p2872_p12 = pneg %p2871_p7  ;;  %p2876_p5 = por %p2875_p2, %p2874_p9 }
  0x74   : > { %p2878_p0 = por %p2877_p6, %p2876_p5 }
  0x76   : > { %p2879_p1 = pnand %p2878_p0, %p2872_p12 }
  0x78   : > { %2882 = shalt.err (!%p2879_p1)
}
  0x79   : > { %s2883_s13 = scalar_lea.vmem %s215_s28, 64  ;;  %p4123_p11 = pmov %p4122_p8 }
  0x7a   : > { %p2884_p4 = scmp.ne.s32.totalorder %s215_s28, %s2883_s13  ;;  %s3054_s24 = smov [#allocation7]  }
  0x7b   : > { %s2888_s9 = sshll.u32 %s3054_s24, 4  ;;  %s2889_s9 = int_to_ptr.vmem [resolvable:$false] %s2888_s9 }
  0x7c   : > { %p2886_p13 = pnand %p2884_p4, %p4123_p11  ;;  %s2890_s6 = scalar_lea.vmem %s2889_s9, 128 }
  0x7d   : > { %p2891_p8 = scmp.lt.s32.totalorder %s215_s28, %s2889_s9  ;;  %p2892_p7 = scmp.lt.s32.totalorder %s2890_s6, %s2883_s13 }
  0x7e   : > { %p2887_p3 = pneg %p2886_p13 }
  0x7f   : > { %p2893_p2 = por %p2892_p7, %p2891_p8 }
  0x81   : > { %p2894_p9 = pnand %p2893_p2, %p2887_p3 }
  0x83   : > { %2897 = shalt.err (!%p2894_p9)
}
  0x84   : > { %2684 = dma.hbm_to_vmem [thread:$0]  (!%p3195_p10), %s3348_s27, 64, %s215_s28, %s3203_s10  }
  0x85   : > { %p4124_p12 = scmp.ne.s32.totalorder %s4107_s11, 0 }
  0x86   : > { %s225_s18 = sand.u32 (!%p4124_p12), 1, %s3024_s19   ;;  %p4125_p5 = scmp.ne.s32.totalorder (!%p4124_p12), %s4111_s5, 0 }
  0x87   : > { %223 = sbr.rel (%p4124_p12) target bundleno = 765 (0x2fd), region = 32  ;;  %s2266_s3 = sshll.u32 (!%p4124_p12), %s225_s18, 10 }
  0x88   : > { %s226_s15 = scalar_lea.sflag (!%p4124_p12), [#allocation3], %s225_s18  ;;  %s3374_s30 = scalar_lea.vmem (!%p4124_p12), [#allocation2], %s2266_s3 }
  0x8e   : > { %2983 = dma.done.wait (%p4125_p5), %s226_s15, 16384  }
  0x8f   : > { %2985 = vsyncadd (%p4125_p5), %s226_s15, 4294950912  ;;  %s234_s29 = sand.u32 1, %s3148_s26   ;;  %s236_s10 = sand.u32 1, %s3012_s16  }
  0x90   : > { %s2267_s11 = sshll.u32 %s236_s10, 11  ;;  %s235_s27 = scalar_lea.sflag [#allocation6], %s234_s29 }
  0x91   : > { %s3384_s28 = scalar_lea.vmem [#allocation5], %s2267_s11  ;;  %p4126_p10 = scmp.ne.s32.totalorder %s4101_s4, 0 }
  0x93   : > { %2987 = dma.done.wait (%p4126_p10), %s235_s27, 32832  }
  0x94   : > { %2989 = vsyncadd (%p4126_p10), %s235_s27, 4294934464  ;;  %v478_v0 = vld [vmem:[%s3384_s28 + $0x8] sm:$0xff]  ;;  %v477_v5 = vld [vmem:[%s3384_s28] sm:$0xff]  ;;  %s4127_s26 = sld [smem:[#allocation13_spill]]  ;;  %s2268_s4 = sshll.u32 %s236_s10, 2 }
  0x95   : > { %v482_v1 = vld [vmem:[%s3384_s28 + $0x28] sm:$0xff]  ;;  %v481_v6 = vld [vmem:[%s3384_s28 + $0x20] sm:$0xff]  ;;  %s247_s5 = scalar_lea.vmem [#allocation7], %s2268_s4  ;;  %s4128_s21 = sld [smem:[#allocation16_spill]] }
  0x96   : > { %v606_v2 = vld [vmem:[%s3384_s28 + $0x408] sm:$0xff]  ;;  %v734_v3 = vpack.c.bf16 %v482_v1, %v478_v0  ;;  %v733_v8 = vpack.c.bf16 %v481_v6, %v477_v5  ;;  %v605_v9 = vld [vmem:[%s3384_s28 + $0x400] sm:$0xff]  ;;  %s4129_s13 = sld [smem:[#allocation15_spill]]  ;;  %s4130_s29 = sld [smem:[#allocation23_spill]] }
  0x97   : > { %v610_v4 = vld [vmem:[%s3384_s28 + $0x428] sm:$0xff]  ;;  %v609_v10 = vld [vmem:[%s3384_s28 + $0x420] sm:$0xff]  ;;  %p4131_p0 = scmp.ne.s32.totalorder %s4114_s7, 0 }
  0x98   : > { %v798_v7 = vpack.c.bf16 %v610_v4, %v606_v2  ;;  %v486_v11 = vld [vmem:[%s3384_s28 + $0x48] sm:$0xff]  ;;  %883 = vmatprep.subr.bf16.mxu0 %v734_v3  ;;  %v797_v12 = vpack.c.bf16 %v609_v10, %v605_v9  ;;  %v485_v18 = vld [vmem:[%s3384_s28 + $0x40] sm:$0xff] }
  0x99   : > { %v490_v13 = vld [vmem:[%s3384_s28 + $0x68] sm:$0xff]  ;;  %884 = vmatpush1.bf16.xpose.msra.mxu0 %v733_v8  ;;  %v489_v19 = vld [vmem:[%s3384_s28 + $0x60] sm:$0xff] }
  0x9a   : > { %v614_v14 = vld [vmem:[%s3384_s28 + $0x448] sm:$0xff]  ;;  %1269 = vmatprep.subr.bf16.mxu1 %v798_v7  ;;  %v738_v16 = vpack.c.bf16 %v490_v13, %v486_v11  ;;  %v613_v20 = vld [vmem:[%s3384_s28 + $0x440] sm:$0xff]  ;;  %v737_v26 = vpack.c.bf16 %v489_v19, %v485_v18  ;;  %s277_s8 = sand.u32 1, %s4127_s26  }
  0x9b   : > { %v618_v15 = vld [vmem:[%s3384_s28 + $0x468] sm:$0xff]  ;;  %1270 = vmatpush1.bf16.xpose.msra.mxu1 %v797_v12  ;;  %v617_v21 = vld [vmem:[%s3384_s28 + $0x460] sm:$0xff]  ;;  %s2269_s22 = sshll.u32 %s277_s8, 9  ;;  %s2666_s24 = smul.u32 384, %s4128_s21 }
  0x9c   : > { %v802_v17 = vpack.c.bf16 %v618_v15, %v614_v14  ;;  %885 = vmatprep.subr.bf16.mxu0 %v738_v16  ;;  %v494_v22 = vld [vmem:[%s3384_s28 + $0x88] sm:$0xff]  ;;  %v801_v27 = vpack.c.bf16 %v617_v21, %v613_v20  ;;  %v493_v30 = vld [vmem:[%s3384_s28 + $0x80] sm:$0xff]  ;;  %s3795_s20 = scalar_lea.vmem [#allocation8], %s2269_s22  ;;  %s2336_s9 = sshll.u32 %s4129_s13, 2 }
  0x9d   : > { %v498_v23 = vld [vmem:[%s3384_s28 + $0xa8] sm:$0xff]  ;;  %v497_v31 = vld [vmem:[%s3384_s28 + $0xa0] sm:$0xff]  ;;  %s2117_s6 = sadd.s32 %s2666_s24, %s2336_s9  ;;  %s2120_s3 = sshll.u32 %s3795_s20, 4  ;;  %s3986_s3 = int_to_ptr.vmem [resolvable:$true] %s2120_s3 }
  0x9e   : > { %1271 = vmatprep.subr.bf16.mxu1 %v802_v17  ;;  %v622_v24 = vld [vmem:[%s3384_s28 + $0x488] sm:$0xff]  ;;  %v742_v28 = vpack.c.bf16 %v498_v23, %v494_v22  ;;  %v621_v32 = vld [vmem:[%s3384_s28 + $0x480] sm:$0xff]  ;;  %v741_v38 = vpack.c.bf16 %v497_v31, %v493_v30  ;;  %s2338_s18 = sshll.u32 %s2117_s6, 6  ;;  %s3993_s11 = scalar_lea.sflag [#allocation4], %s277_s8 }
  0x9f   : > { %v626_v25 = vld [vmem:[%s3384_s28 + $0x4a8] sm:$0xff]  ;;  %v625_v33 = vld [vmem:[%s3384_s28 + $0x4a0] sm:$0xff]  ;;  %s3983_s10 = scalar_lea.hbm %s4130_s29, %s2338_s18  ;;  %s2898_s27 = scalar_lea.vmem %s3986_s3, 8192 }
  0xa0   : > { %v806_v29 = vpack.c.bf16 %v626_v25, %v622_v24  ;;  %v502_v34 = vld [vmem:[%s3384_s28 + $0xc8] sm:$0xff]  ;;  %v805_v39 = vpack.c.bf16 %v625_v33, %v621_v32  ;;  %v501_v42 = vld [vmem:[%s3384_s28 + $0xc0] sm:$0xff]  ;;  %p2899_p6 = scmp.ne.s32.totalorder %s3986_s3, %s2898_s27 }
  0xa1   : > { %886 = vmatpush1.bf16.xpose.msra.mxu0 %v737_v26  ;;  %v506_v35 = vld [vmem:[%s3384_s28 + $0xe8] sm:$0xff]  ;;  %v505_v43 = vld [vmem:[%s3384_s28 + $0xe0] sm:$0xff] }
  0xa2   : > { %887 = vmatprep.subr.bf16.mxu0 %v742_v28  ;;  %v630_v36 = vld [vmem:[%s3384_s28 + $0x4c8] sm:$0xff]  ;;  %v746_v40 = vpack.c.bf16 %v506_v35, %v502_v34  ;;  %v629_v44 = vld [vmem:[%s3384_s28 + $0x4c0] sm:$0xff]  ;;  %v745_v50 = vpack.c.bf16 %v505_v43, %v501_v42  ;;  %p2900_p1 = pnand %p2899_p6, %p4131_p0 }
  0xa3   : > { %1272 = vmatpush1.bf16.xpose.msra.mxu1 %v801_v27  ;;  %v634_v37 = vld [vmem:[%s3384_s28 + $0x4e8] sm:$0xff]  ;;  %v633_v45 = vld [vmem:[%s3384_s28 + $0x4e0] sm:$0xff] }
  0xa4   : > { %1273 = vmatprep.subr.bf16.mxu1 %v806_v29  ;;  %v810_v41 = vpack.c.bf16 %v634_v37, %v630_v36  ;;  %v510_v46 = vld [vmem:[%s3384_s28 + $0x108] sm:$0xff]  ;;  %v809_v51 = vpack.c.bf16 %v633_v45, %v629_v44  ;;  %v509_v54 = vld [vmem:[%s3384_s28 + $0x100] sm:$0xff]  ;;  %p2901_p4 = pneg %p2900_p1 }
  0xa5   : > { %v514_v47 = vld [vmem:[%s3384_s28 + $0x128] sm:$0xff]  ;;  %v513_v55 = vld [vmem:[%s3384_s28 + $0x120] sm:$0xff] }
  0xa6   : > { %v638_v48 = vld [vmem:[%s3384_s28 + $0x508] sm:$0xff]  ;;  %v750_v52 = vpack.c.bf16 %v514_v47, %v510_v46  ;;  %v637_v56 = vld [vmem:[%s3384_s28 + $0x500] sm:$0xff]  ;;  %v749_v62 = vpack.c.bf16 %v513_v55, %v509_v54 }
  0xa7   : > { %v642_v49 = vld [vmem:[%s3384_s28 + $0x528] sm:$0xff]  ;;  %v641_v57 = vld [vmem:[%s3384_s28 + $0x520] sm:$0xff] }
  0xa8   : > { %v814_v53 = vpack.c.bf16 %v642_v49, %v638_v48  ;;  %v518_v58 = vld [vmem:[%s3384_s28 + $0x148] sm:$0xff]  ;;  %v813_v63 = vpack.c.bf16 %v641_v57, %v637_v56  ;;  %v517_v2 = vld [vmem:[%s3384_s28 + $0x140] sm:$0xff] }
  0xa9   : > { %888 = vmatpush1.bf16.xpose.msra.mxu0 %v741_v38  ;;  %v522_v59 = vld [vmem:[%s3384_s28 + $0x168] sm:$0xff]  ;;  %v521_v3 = vld [vmem:[%s3384_s28 + $0x160] sm:$0xff] }
  0xaa   : > { %889 = vmatprep.subr.bf16.mxu0 %v746_v40  ;;  %v646_v60 = vld [vmem:[%s3384_s28 + $0x548] sm:$0xff]  ;;  %v754_v0 = vpack.c.bf16 %v522_v59, %v518_v58  ;;  %v645_v4 = vld [vmem:[%s3384_s28 + $0x540] sm:$0xff]  ;;  %v753_v10 = vpack.c.bf16 %v521_v3, %v517_v2 }
  0xab   : > { %1274 = vmatpush1.bf16.xpose.msra.mxu1 %v805_v39  ;;  %v650_v61 = vld [vmem:[%s3384_s28 + $0x568] sm:$0xff]  ;;  %v649_v5 = vld [vmem:[%s3384_s28 + $0x560] sm:$0xff] }
  0xac   : > { %1275 = vmatprep.subr.bf16.mxu1 %v810_v41  ;;  %v818_v1 = vpack.c.bf16 %v650_v61, %v646_v60  ;;  %v526_v6 = vld [vmem:[%s3384_s28 + $0x188] sm:$0xff]  ;;  %v817_v11 = vpack.c.bf16 %v649_v5, %v645_v4  ;;  %v525_v17 = vld [vmem:[%s3384_s28 + $0x180] sm:$0xff] }
  0xad   : > { %v530_v7 = vld [vmem:[%s3384_s28 + $0x1a8] sm:$0xff]  ;;  %v529_v18 = vld [vmem:[%s3384_s28 + $0x1a0] sm:$0xff] }
  0xae   : > { %v654_v8 = vld [vmem:[%s3384_s28 + $0x588] sm:$0xff]  ;;  %v758_v12 = vpack.c.bf16 %v530_v7, %v526_v6  ;;  %v653_v19 = vld [vmem:[%s3384_s28 + $0x580] sm:$0xff]  ;;  %v757_v25 = vpack.c.bf16 %v529_v18, %v525_v17 }
  0xaf   : > { %v658_v9 = vld [vmem:[%s3384_s28 + $0x5a8] sm:$0xff]  ;;  %v657_v20 = vld [vmem:[%s3384_s28 + $0x5a0] sm:$0xff] }
  0xb0   : > { %v822_v13 = vpack.c.bf16 %v658_v9, %v654_v8  ;;  %v286_v14 = vld [vmem:[%s3374_s30 + $0x8] sm:$0xff]  ;;  %v821_v26 = vpack.c.bf16 %v657_v20, %v653_v19  ;;  %v533_v29 = vld [vmem:[%s3384_s28 + $0x1c0] sm:$0xff] }
  0xb1   : > { %890 = vmatpush1.bf16.xpose.msra.mxu0 %v745_v50  ;;  %v290_v15 = vld [vmem:[%s3374_s30 + $0x28] sm:$0xff]  ;;  %v537_v30 = vld [vmem:[%s3384_s28 + $0x1e0] sm:$0xff] }
  0xb2   : > { %891 = vmatprep.subr.bf16.mxu0 %v750_v52  ;;  %v414_v16 = vpack.c.bf16 %v290_v15, %v286_v14  ;;  %v534_v21 = vld [vmem:[%s3384_s28 + $0x1c8] sm:$0xff]  ;;  %v661_v31 = vld [vmem:[%s3384_s28 + $0x5c0] sm:$0xff]  ;;  %v761_v37 = vpack.c.bf16 %v537_v30, %v533_v29 }
  0xb3   : > { %1276 = vmatpush1.bf16.xpose.msra.mxu1 %v809_v51  ;;  %v538_v22 = vld [vmem:[%s3384_s28 + $0x1e8] sm:$0xff]  ;;  %v665_v32 = vld [vmem:[%s3384_s28 + $0x5e0] sm:$0xff] }
  0xb4   : > { %1277 = vmatprep.subr.bf16.mxu1 %v814_v53  ;;  %915 = vmatprep.mubr.bf16.mxu0 %v414_v16  ;;  %v662_v23 = vld [vmem:[%s3384_s28 + $0x5c8] sm:$0xff]  ;;  %v762_v27 = vpack.c.bf16 %v538_v22, %v534_v21  ;;  %v825_v38 = vpack.c.bf16 %v665_v32, %v661_v31  ;;  %v541_v41 = vld [vmem:[%s3384_s28 + $0x200] sm:$0xff] }
  0xb5   : > { %v666_v24 = vld [vmem:[%s3384_s28 + $0x5e8] sm:$0xff]  ;;  %1301 = vmatprep.mubr.bf16.mxu1 %v414_v16  ;;  %v545_v42 = vld [vmem:[%s3384_s28 + $0x220] sm:$0xff] }
  0xb6   : > { %v826_v28 = vpack.c.bf16 %v666_v24, %v662_v23  ;;  %v542_v33 = vld [vmem:[%s3384_s28 + $0x208] sm:$0xff]  ;;  %v669_v43 = vld [vmem:[%s3384_s28 + $0x600] sm:$0xff]  ;;  %v765_v49 = vpack.c.bf16 %v545_v42, %v541_v41 }
  0xb7   : > { %v546_v34 = vld [vmem:[%s3384_s28 + $0x228] sm:$0xff]  ;;  %v673_v44 = vld [vmem:[%s3384_s28 + $0x620] sm:$0xff] }
  0xb8   : > { %v670_v35 = vld [vmem:[%s3384_s28 + $0x608] sm:$0xff]  ;;  %v766_v39 = vpack.c.bf16 %v546_v34, %v542_v33  ;;  %v829_v50 = vpack.c.bf16 %v673_v44, %v669_v43  ;;  %v549_v53 = vld [vmem:[%s3384_s28 + $0x240] sm:$0xff] }
  0xb9   : > { %892 = vmatpush1.bf16.xpose.msra.mxu0 %v749_v62  ;;  %v674_v36 = vld [vmem:[%s3384_s28 + $0x628] sm:$0xff]  ;;  %v553_v54 = vld [vmem:[%s3384_s28 + $0x260] sm:$0xff] }
  0xba   : > { %893 = vmatprep.subr.bf16.mxu0 %v754_v0  ;;  %v830_v40 = vpack.c.bf16 %v674_v36, %v670_v35  ;;  %v550_v45 = vld [vmem:[%s3384_s28 + $0x248] sm:$0xff]  ;;  %v677_v55 = vld [vmem:[%s3384_s28 + $0x640] sm:$0xff]  ;;  %v769_v61 = vpack.c.bf16 %v553_v54, %v549_v53 }
  0xbb   : > { %1278 = vmatpush1.bf16.xpose.msra.mxu1 %v813_v63  ;;  %v554_v46 = vld [vmem:[%s3384_s28 + $0x268] sm:$0xff]  ;;  %v681_v56 = vld [vmem:[%s3384_s28 + $0x660] sm:$0xff] }
  0xbc   : > { %1279 = vmatprep.subr.bf16.mxu1 %v818_v1  ;;  %v678_v47 = vld [vmem:[%s3384_s28 + $0x648] sm:$0xff]  ;;  %v770_v51 = vpack.c.bf16 %v554_v46, %v550_v45  ;;  %v833_v62 = vpack.c.bf16 %v681_v56, %v677_v55  ;;  %v557_v1 = vld [vmem:[%s3384_s28 + $0x280] sm:$0xff] }
  0xbd   : > { %v682_v48 = vld [vmem:[%s3384_s28 + $0x668] sm:$0xff]  ;;  %v561_v2 = vld [vmem:[%s3384_s28 + $0x2a0] sm:$0xff] }
  0xbe   : > { %v834_v52 = vpack.c.bf16 %v682_v48, %v678_v47  ;;  %v558_v57 = vld [vmem:[%s3384_s28 + $0x288] sm:$0xff]  ;;  %v685_v3 = vld [vmem:[%s3384_s28 + $0x680] sm:$0xff]  ;;  %v773_v9 = vpack.c.bf16 %v561_v2, %v557_v1  ;;  %v480_v1 = vld [vmem:[%s3384_s28 + $0x18] sm:$0xff] }
  0xbf   : > { %v562_v58 = vld [vmem:[%s3384_s28 + $0x2a8] sm:$0xff]  ;;  %v689_v4 = vld [vmem:[%s3384_s28 + $0x6a0] sm:$0xff]  ;;  %v484_v2 = vld [vmem:[%s3384_s28 + $0x38] sm:$0xff] }
  0xc0   : > { %v686_v59 = vld [vmem:[%s3384_s28 + $0x688] sm:$0xff]  ;;  %v774_v63 = vpack.c.bf16 %v562_v58, %v558_v57  ;;  %v569_v14 = vld [vmem:[%s3384_s28 + $0x2e0] sm:$0xff] }
  0xc1   : > { %894 = vmatpush1.bf16.xpose.msra.mxu0 %v753_v10  ;;  %v690_v60 = vld [vmem:[%s3384_s28 + $0x6a8] sm:$0xff]  ;;  %v837_v10 = vpack.c.bf16 %v689_v4, %v685_v3  ;;  %v693_v15 = vld [vmem:[%s3384_s28 + $0x6c0] sm:$0xff]  ;;  %v608_v3 = vld [vmem:[%s3384_s28 + $0x418] sm:$0xff] }
  0xc2   : > { %895 = vmatprep.subr.bf16.mxu0 %v758_v12  ;;  %v838_v0 = vpack.c.bf16 %v690_v60, %v686_v59  ;;  %v566_v5 = vld [vmem:[%s3384_s28 + $0x2c8] sm:$0xff]  ;;  %v697_v16 = vld [vmem:[%s3384_s28 + $0x6e0] sm:$0xff]  ;;  %v612_v4 = vld [vmem:[%s3384_s28 + $0x438] sm:$0xff] }
  0xc3   : > { %1280 = vmatpush1.bf16.xpose.msra.mxu1 %v817_v11  ;;  %v570_v6 = vld [vmem:[%s3384_s28 + $0x2e8] sm:$0xff]  ;;  %v841_v22 = vpack.c.bf16 %v697_v16, %v693_v15 }
  0xc4   : > { %1281 = vmatprep.subr.bf16.mxu1 %v822_v13  ;;  %v694_v7 = vld [vmem:[%s3384_s28 + $0x6c8] sm:$0xff]  ;;  %v778_v11 = vpack.c.bf16 %v570_v6, %v566_v5  ;;  %v565_v13 = vld [vmem:[%s3384_s28 + $0x2c0] sm:$0xff] }
  0xc5   : > { %v698_v8 = vld [vmem:[%s3384_s28 + $0x6e8] sm:$0xff]  ;;  %v777_v21 = vpack.c.bf16 %v569_v14, %v565_v13  ;;  %v607_v13 = vld [vmem:[%s3384_s28 + $0x410] sm:$0xff] }
  0xc6   : > { %v842_v12 = vpack.c.bf16 %v698_v8, %v694_v7  ;;  %v574_v17 = vld [vmem:[%s3384_s28 + $0x308] sm:$0xff]  ;;  %v736_v7 = vpack.c.bf16 %v484_v2, %v480_v1  ;;  %v800_v8 = vpack.c.bf16 %v612_v4, %v608_v3  ;;  %v611_v14 = vld [vmem:[%s3384_s28 + $0x430] sm:$0xff] }
  0xc7   : > { %v578_v18 = vld [vmem:[%s3384_s28 + $0x328] sm:$0xff]  ;;  %v503_v1 = vld [vmem:[%s3384_s28 + $0xd0] sm:$0xff] }
  0xc8   : > { %v702_v19 = vld [vmem:[%s3384_s28 + $0x708] sm:$0xff]  ;;  %v782_v23 = vpack.c.bf16 %v578_v18, %v574_v17  ;;  %v488_v18 = vld [vmem:[%s3384_s28 + $0x58] sm:$0xff]  ;;  %v507_v2 = vld [vmem:[%s3384_s28 + $0xf0] sm:$0xff] }
  0xc9   : > { %896 = vmatpush1.bf16.xpose.msra.mxu0 %v757_v25  ;;  %v706_v20 = vld [vmem:[%s3384_s28 + $0x728] sm:$0xff]  ;;  %v573_v25 = vld [vmem:[%s3384_s28 + $0x300] sm:$0xff]  ;;  %v631_v3 = vld [vmem:[%s3384_s28 + $0x4d0] sm:$0xff] }
  0xca   : > { %897 = vmatprep.subr.bf16.mxu0 %v762_v27  ;;  %v846_v24 = vpack.c.bf16 %v706_v20, %v702_v19  ;;  %v701_v27 = vld [vmem:[%s3384_s28 + $0x700] sm:$0xff]  ;;  %v582_v29 = vld [vmem:[%s3384_s28 + $0x348] sm:$0xff]  ;;  %v492_v19 = vld [vmem:[%s3384_s28 + $0x78] sm:$0xff] }
  0xcb   : > { %1282 = vmatpush1.bf16.xpose.msra.mxu1 %v821_v26  ;;  %v577_v26 = vld [vmem:[%s3384_s28 + $0x320] sm:$0xff]  ;;  %v586_v30 = vld [vmem:[%s3384_s28 + $0x368] sm:$0xff]  ;;  %v635_v4 = vld [vmem:[%s3384_s28 + $0x4f0] sm:$0xff] }
  0xcc   : > { %1283 = vmatprep.subr.bf16.mxu1 %v826_v28  ;;  %v705_v28 = vld [vmem:[%s3384_s28 + $0x720] sm:$0xff]  ;;  %v710_v31 = vld [vmem:[%s3384_s28 + $0x748] sm:$0xff]  ;;  %v781_v33 = vpack.c.bf16 %v577_v26, %v573_v25  ;;  %v786_v35 = vpack.c.bf16 %v586_v30, %v582_v29  ;;  %v740_v25 = vpack.c.bf16 %v492_v19, %v488_v18  ;;  %v487_v29 = vld [vmem:[%s3384_s28 + $0x50] sm:$0xff] }
  0xcd   : > { %v714_v32 = vld [vmem:[%s3384_s28 + $0x768] sm:$0xff]  ;;  %v845_v34 = vpack.c.bf16 %v705_v28, %v701_v27  ;;  %v293_v27 = vld [vmem:[%s3374_s30 + $0x40] sm:$0xff]  ;;  %v491_v30 = vld [vmem:[%s3384_s28 + $0x70] sm:$0xff] }
  0xce   : > { %v850_v36 = vpack.c.bf16 %v714_v32, %v710_v31  ;;  %v590_v41 = vld [vmem:[%s3384_s28 + $0x388] sm:$0xff]  ;;  %v297_v28 = vld [vmem:[%s3374_s30 + $0x60] sm:$0xff]  ;;  %v615_v31 = vld [vmem:[%s3384_s28 + $0x450] sm:$0xff] }
  0xcf   : > { %v594_v42 = vld [vmem:[%s3384_s28 + $0x3a8] sm:$0xff]  ;;  %v619_v32 = vld [vmem:[%s3384_s28 + $0x470] sm:$0xff]  ;;  %v321_v18 = vld [vmem:[%s3374_s30 + $0x120] sm:$0xff] }
  0xd0   : > { %v718_v43 = vld [vmem:[%s3384_s28 + $0x788] sm:$0xff]  ;;  %v790_v47 = vpack.c.bf16 %v594_v42, %v590_v41  ;;  %v803_v41 = vpack.c.bf16 %v619_v32, %v615_v31  ;;  %v511_v19 = vld [vmem:[%s3384_s28 + $0x110] sm:$0xff] }
  0xd1   : > { %898 = vmatpush1.bf16.xpose.msra.mxu0 %v761_v37  ;;  %v581_v37 = vld [vmem:[%s3384_s28 + $0x340] sm:$0xff]  ;;  %v722_v44 = vld [vmem:[%s3384_s28 + $0x7a8] sm:$0xff] }
  0xd2   : > { %899 = vmatprep.subr.bf16.mxu0 %v766_v39  ;;  %v709_v39 = vld [vmem:[%s3384_s28 + $0x740] sm:$0xff]  ;;  %v854_v48 = vpack.c.bf16 %v722_v44, %v718_v43  ;;  %v598_v53 = vld [vmem:[%s3384_s28 + $0x3c8] sm:$0xff] }
  0xd3   : > { %1284 = vmatpush1.bf16.xpose.msra.mxu1 %v825_v38  ;;  %v585_v38 = vld [vmem:[%s3384_s28 + $0x360] sm:$0xff]  ;;  %v602_v54 = vld [vmem:[%s3384_s28 + $0x3e8] sm:$0xff] }
  0xd4   : > { %1285 = vmatprep.subr.bf16.mxu1 %v830_v40  ;;  %v713_v40 = vld [vmem:[%s3384_s28 + $0x760] sm:$0xff]  ;;  %v785_v45 = vpack.c.bf16 %v585_v38, %v581_v37  ;;  %v726_v55 = vld [vmem:[%s3384_s28 + $0x7c8] sm:$0xff]  ;;  %v794_v59 = vpack.c.bf16 %v602_v54, %v598_v53  ;;  %v500_v37 = vld [vmem:[%s3384_s28 + $0xb8] sm:$0xff]  ;;  %v739_v38 = vpack.c.bf16 %v491_v30, %v487_v29 }
  0xd5   : > { %v849_v46 = vpack.c.bf16 %v713_v40, %v709_v39  ;;  %v730_v56 = vld [vmem:[%s3384_s28 + $0x7e8] sm:$0xff]  ;;  %v624_v39 = vld [vmem:[%s3384_s28 + $0x498] sm:$0xff] }
  0xd6   : > { %v858_v60 = vpack.c.bf16 %v730_v56, %v726_v55  ;;  %v294_v15 = vld [vmem:[%s3374_s30 + $0x48] sm:$0xff]  ;;  %v628_v40 = vld [vmem:[%s3384_s28 + $0x4b8] sm:$0xff] }
  0xd7   : > { %v298_v16 = vld [vmem:[%s3374_s30 + $0x68] sm:$0xff]  ;;  %v808_v44 = vpack.c.bf16 %v628_v40, %v624_v39  ;;  %v504_v54 = vld [vmem:[%s3384_s28 + $0xd8] sm:$0xff]  ;;  %v647_v39 = vld [vmem:[%s3384_s28 + $0x550] sm:$0xff] }
  0xd8   : > { %v508_v55 = vld [vmem:[%s3384_s28 + $0xf8] sm:$0xff]  ;;  %v651_v40 = vld [vmem:[%s3384_s28 + $0x570] sm:$0xff] }
  0xd9   : > { %900 = vmatpush1.bf16.xpose.msra.mxu0 %v765_v49  ;;  %v589_v49 = vld [vmem:[%s3384_s28 + $0x380] sm:$0xff]  ;;  %v648_v29 = vld [vmem:[%s3384_s28 + $0x558] sm:$0xff] }
  0xda   : > { %901 = vmatprep.subr.bf16.mxu0 %v770_v51  ;;  %v717_v51 = vld [vmem:[%s3384_s28 + $0x780] sm:$0xff]  ;;  %v652_v30 = vld [vmem:[%s3384_s28 + $0x578] sm:$0xff] }
  0xdb   : > { %1286 = vmatpush1.bf16.xpose.msra.mxu1 %v829_v50  ;;  %v593_v50 = vld [vmem:[%s3384_s28 + $0x3a0] sm:$0xff] }
  0xdc   : > { %1287 = vmatprep.subr.bf16.mxu1 %v834_v52  ;;  %v721_v52 = vld [vmem:[%s3384_s28 + $0x7a0] sm:$0xff]  ;;  %v789_v57 = vpack.c.bf16 %v593_v50, %v589_v49  ;;  %v623_v49 = vld [vmem:[%s3384_s28 + $0x490] sm:$0xff] }
  0xdd   : > { %v853_v58 = vpack.c.bf16 %v721_v52, %v717_v51  ;;  %v627_v50 = vld [vmem:[%s3384_s28 + $0x4b0] sm:$0xff]  ;;  %v310_v51 = vld [vmem:[%s3374_s30 + $0xc8] sm:$0xff] }
  0xde   : > { %v314_v52 = vld [vmem:[%s3374_s30 + $0xe8] sm:$0xff] }
  0xe1   : > { %902 = vmatpush1.bf16.xpose.msra.mxu0 %v769_v61  ;;  %v597_v61 = vld [vmem:[%s3384_s28 + $0x3c0] sm:$0xff] }
  0xe2   : > { %903 = vmatprep.subr.bf16.mxu0 %v774_v63  ;;  %v725_v63 = vld [vmem:[%s3384_s28 + $0x7c0] sm:$0xff] }
  0xe3   : > { %1288 = vmatpush1.bf16.xpose.msra.mxu1 %v833_v62  ;;  %v601_v62 = vld [vmem:[%s3384_s28 + $0x3e0] sm:$0xff] }
  0xe4   : > { %1289 = vmatprep.subr.bf16.mxu1 %v838_v0  ;;  %v729_v0 = vld [vmem:[%s3384_s28 + $0x7e0] sm:$0xff]  ;;  %v793_v5 = vpack.c.bf16 %v601_v62, %v597_v61  ;;  %v748_v61 = vpack.c.bf16 %v508_v55, %v504_v54  ;;  %v527_v55 = vld [vmem:[%s3384_s28 + $0x190] sm:$0xff] }
  0xe5   : > { %v857_v6 = vpack.c.bf16 %v729_v0, %v725_v63  ;;  %v309_v63 = vld [vmem:[%s3374_s30 + $0xc0] sm:$0xff] }
  0xe6   : > { %v313_v0 = vld [vmem:[%s3374_s30 + $0xe0] sm:$0xff] }
  0xe7   : > { %v337_v54 = vld [vmem:[%s3374_s30 + $0x1a0] sm:$0xff] }
  0xe9   : > { %904 = vmatpush1.bf16.xpose.msra.mxu0 %v773_v9  ;;  %v285_v9 = vld [vmem:[%s3374_s30] sm:$0xff] }
  0xea   : > { %905 = vmatprep.subr.bf16.mxu0 %v778_v11  ;;  %v479_v11 = vld [vmem:[%s3384_s28 + $0x10] sm:$0xff] }
  0xeb   : > { %1290 = vmatpush1.bf16.xpose.msra.mxu1 %v837_v10  ;;  %v289_v10 = vld [vmem:[%s3374_s30 + $0x20] sm:$0xff] }
  0xec   : > { %1291 = vmatprep.subr.bf16.mxu1 %v842_v12  ;;  %v483_v12 = vld [vmem:[%s3384_s28 + $0x30] sm:$0xff]  ;;  %v413_v17 = vpack.c.bf16 %v289_v10, %v285_v9  ;;  %v516_v9 = vld [vmem:[%s3384_s28 + $0x138] sm:$0xff]  ;;  %v747_v10 = vpack.c.bf16 %v507_v2, %v503_v1 }
  0xed   : > { %v735_v20 = vpack.c.bf16 %v483_v12, %v479_v11  ;;  %v640_v11 = vld [vmem:[%s3384_s28 + $0x518] sm:$0xff] }
  0xee   : > { %v644_v12 = vld [vmem:[%s3384_s28 + $0x538] sm:$0xff] }
  0xef   : > { %v664_v1 = vld [vmem:[%s3384_s28 + $0x5d8] sm:$0xff] }
  0xf0   : > { %v668_v2 = vld [vmem:[%s3384_s28 + $0x5f8] sm:$0xff] }
  0xf1   : > { %906 = vmatpush1.bf16.xpose.msra.mxu0 %v777_v21  ;;  %v616_v21 = vld [vmem:[%s3384_s28 + $0x458] sm:$0xff] }
  0xf2   : > { %907 = vmatprep.subr.bf16.mxu0 %v782_v23  ;;  %v799_v23 = vpack.c.bf16 %v611_v14, %v607_v13  ;;  %v811_v13 = vpack.c.bf16 %v635_v4, %v631_v3 }
  0xf3   : > { %1292 = vmatpush1.bf16.xpose.msra.mxu1 %v841_v22  ;;  %v620_v22 = vld [vmem:[%s3384_s28 + $0x478] sm:$0xff] }
  0xf4   : > { %1293 = vmatprep.subr.bf16.mxu1 %v846_v24  ;;  %v418_v24 = vpack.c.bf16 %v298_v16, %v294_v15  ;;  %v804_v26 = vpack.c.bf16 %v620_v22, %v616_v21  ;;  %v816_v16 = vpack.c.bf16 %v644_v12, %v640_v11  ;;  %v639_v21 = vld [vmem:[%s3384_s28 + $0x510] sm:$0xff] }
  0xf5   : > { %v643_v22 = vld [vmem:[%s3384_s28 + $0x530] sm:$0xff] }
  0xf6   : > { %v815_v31 = vpack.c.bf16 %v643_v22, %v639_v21  ;;  %v663_v11 = vld [vmem:[%s3384_s28 + $0x5d0] sm:$0xff] }
  0xf7   : > { %v667_v12 = vld [vmem:[%s3384_s28 + $0x5f0] sm:$0xff] }
  0xf8   : > { %v827_v21 = vpack.c.bf16 %v667_v12, %v663_v11 }
  0xf9   : > { %908 = vmatpush1.bf16.xpose.msra.mxu0 %v781_v33  ;;  %v302_v33 = vld [vmem:[%s3374_s30 + $0x88] sm:$0xff] }
  0xfa   : > { %909 = vmatprep.subr.bf16.mxu0 %v786_v35  ;;  %v417_v35 = vpack.c.bf16 %v297_v28, %v293_v27  ;;  %v524_v27 = vld [vmem:[%s3384_s28 + $0x178] sm:$0xff] }
  0xfb   : > { %1294 = vmatpush1.bf16.xpose.msra.mxu1 %v845_v34  ;;  %v306_v34 = vld [vmem:[%s3374_s30 + $0xa8] sm:$0xff] }
  0xfc   : > { %1295 = vmatprep.subr.bf16.mxu1 %v850_v36  ;;  %v496_v36 = vld [vmem:[%s3384_s28 + $0x98] sm:$0xff]  ;;  %v422_v42 = vpack.c.bf16 %v306_v34, %v302_v33  ;;  %v820_v34 = vpack.c.bf16 %v652_v30, %v648_v29  ;;  %v671_v29 = vld [vmem:[%s3384_s28 + $0x610] sm:$0xff] }
  0xfd   : > { %v744_v43 = vpack.c.bf16 %v500_v37, %v496_v36  ;;  %v329_v36 = vld [vmem:[%s3374_s30 + $0x160] sm:$0xff]  ;;  %v519_v37 = vld [vmem:[%s3384_s28 + $0x150] sm:$0xff] }
  0xfe   : > { %v675_v30 = vld [vmem:[%s3384_s28 + $0x630] sm:$0xff] }
 0x101   : > { %910 = vmatpush1.bf16.xpose.msra.mxu0 %v785_v45  ;;  %v301_v45 = vld [vmem:[%s3374_s30 + $0x80] sm:$0xff] }
 0x102   : > { %911 = vmatprep.subr.bf16.mxu0 %v790_v47  ;;  %v495_v47 = vld [vmem:[%s3384_s28 + $0x90] sm:$0xff] }
 0x103   : > { %1296 = vmatpush1.bf16.xpose.msra.mxu1 %v849_v46  ;;  %v305_v46 = vld [vmem:[%s3374_s30 + $0xa0] sm:$0xff] }
 0x104   : > { %1297 = vmatprep.subr.bf16.mxu1 %v854_v48  ;;  %v499_v48 = vld [vmem:[%s3384_s28 + $0xb0] sm:$0xff]  ;;  %v421_v53 = vpack.c.bf16 %v305_v46, %v301_v45  ;;  %v532_v45 = vld [vmem:[%s3384_s28 + $0x1b8] sm:$0xff] }
 0x105   : > { %v743_v56 = vpack.c.bf16 %v499_v48, %v495_v47  ;;  %v656_v47 = vld [vmem:[%s3384_s28 + $0x598] sm:$0xff] }
 0x106   : > { %v660_v48 = vld [vmem:[%s3384_s28 + $0x5b8] sm:$0xff] }
 0x109   : > { %912 = vmatpush1.bf16.xpose.msra.mxu0 %v789_v57  ;;  %v632_v57 = vld [vmem:[%s3384_s28 + $0x4d8] sm:$0xff] }
 0x10a   : > { %913 = vmatprep.subr.bf16.mxu0 %v794_v59  ;;  %v807_v59 = vpack.c.bf16 %v627_v50, %v623_v49  ;;  %v819_v49 = vpack.c.bf16 %v651_v40, %v647_v39  ;;  %v831_v39 = vpack.c.bf16 %v675_v30, %v671_v29 }
 0x10b   : > { %1298 = vmatpush1.bf16.xpose.msra.mxu1 %v853_v58  ;;  %v636_v58 = vld [vmem:[%s3384_s28 + $0x4f8] sm:$0xff] }
 0x10c   : > { %1299 = vmatprep.subr.bf16.mxu1 %v858_v60  ;;  %v426_v60 = vpack.c.bf16 %v314_v52, %v310_v51  ;;  %v812_v62 = vpack.c.bf16 %v636_v58, %v632_v57  ;;  %v824_v52 = vpack.c.bf16 %v660_v48, %v656_v47  ;;  %v655_v57 = vld [vmem:[%s3384_s28 + $0x590] sm:$0xff] }
 0x10d   : > { %v659_v58 = vld [vmem:[%s3384_s28 + $0x5b0] sm:$0xff] }
 0x10e   : > { %v823_v3 = vpack.c.bf16 %v659_v58, %v655_v57  ;;  %v679_v47 = vld [vmem:[%s3384_s28 + $0x650] sm:$0xff] }
 0x10f   : > { %v683_v48 = vld [vmem:[%s3384_s28 + $0x670] sm:$0xff] }
 0x110   : > { %v835_v57 = vpack.c.bf16 %v683_v48, %v679_v47 }
 0x111   : > { %914 = vmatpush1.bf16.xpose.msra.mxu0 %v793_v5  ;;  %v318_v5 = vld [vmem:[%s3374_s30 + $0x108] sm:$0xff] }
 0x112   : > { %1076 = vmatprep.subr.bf16.mxu0 %v736_v7  ;;  %v425_v7 = vpack.c.bf16 %v313_v0, %v309_v63  ;;  %v540_v63 = vld [vmem:[%s3384_s28 + $0x1f8] sm:$0xff] }
 0x113   : > { %1300 = vmatpush1.bf16.xpose.msra.mxu1 %v857_v6  ;;  %v322_v6 = vld [vmem:[%s3374_s30 + $0x128] sm:$0xff] }
 0x114   : > { %1462 = vmatprep.subr.bf16.mxu1 %v800_v8  ;;  %v512_v8 = vld [vmem:[%s3384_s28 + $0x118] sm:$0xff]  ;;  %v430_v14 = vpack.c.bf16 %v322_v6, %v318_v5  ;;  %v828_v6 = vpack.c.bf16 %v668_v2, %v664_v1  ;;  %v687_v1 = vld [vmem:[%s3384_s28 + $0x690] sm:$0xff] }
 0x115   : > { %v752_v15 = vpack.c.bf16 %v516_v9, %v512_v8  ;;  %v345_v8 = vld [vmem:[%s3374_s30 + $0x1e0] sm:$0xff]  ;;  %v535_v9 = vld [vmem:[%s3384_s28 + $0x1d0] sm:$0xff] }
 0x116   : > { %v691_v2 = vld [vmem:[%s3384_s28 + $0x6b0] sm:$0xff] }
 0x117   : > { %v839_v11 = vpack.c.bf16 %v691_v2, %v687_v1 }
 0x118   : > { %916 = vmatmul.mubr.bf16.vlgmr.msra.gmra.mrb[0].mxu0 %v413_v17 }
 0x119   : > { %1077 = vmatpush1.bf16.xpose.msra.mxu0 %v735_v20  ;;  %925 = vmatprep.mubr.bf16.mxu0 %v418_v24  ;;  %v515_v20 = vld [vmem:[%s3384_s28 + $0x130] sm:$0xff] }
 0x11a   : > { %1302 = vmatmul.mubr.bf16.vlgmr.msra.gmra.mrb[0].mxu1 %v413_v17  ;;  %1078 = vmatprep.subr.bf16.mxu0 %v740_v25  ;;  %v317_v17 = vld [vmem:[%s3374_s30 + $0x100] sm:$0xff]  ;;  %v751_v28 = vpack.c.bf16 %v515_v20, %v511_v19  ;;  %v672_v19 = vld [vmem:[%s3384_s28 + $0x618] sm:$0xff] }
 0x11b   : > { %1463 = vmatpush1.bf16.xpose.msra.mxu1 %v799_v23  ;;  %1311 = vmatprep.mubr.bf16.mxu1 %v418_v24  ;;  %v326_v23 = vld [vmem:[%s3374_s30 + $0x148] sm:$0xff]  ;;  %v429_v25 = vpack.c.bf16 %v321_v18, %v317_v17  ;;  %v548_v17 = vld [vmem:[%s3384_s28 + $0x238] sm:$0xff] }
 0x11c   : > { %1464 = vmatprep.subr.bf16.mxu1 %v804_v26  ;;  %v330_v24 = vld [vmem:[%s3374_s30 + $0x168] sm:$0xff]  ;;  %v520_v26 = vld [vmem:[%s3384_s28 + $0x158] sm:$0xff] }
 0x11d   : > { %v434_v32 = vpack.c.bf16 %v330_v24, %v326_v23  ;;  %v756_v33 = vpack.c.bf16 %v524_v27, %v520_v26  ;;  %v676_v20 = vld [vmem:[%s3384_s28 + $0x638] sm:$0xff]  ;;  %v353_v26 = vld [vmem:[%s3374_s30 + $0x220] sm:$0xff]  ;;  %v543_v27 = vld [vmem:[%s3384_s28 + $0x210] sm:$0xff] }
 0x11e   : > { %v832_v24 = vpack.c.bf16 %v676_v20, %v672_v19  ;;  %v695_v19 = vld [vmem:[%s3384_s28 + $0x6d0] sm:$0xff] }
 0x11f   : > { %v699_v20 = vld [vmem:[%s3384_s28 + $0x6f0] sm:$0xff] }
 0x120   : > { %926 = vmatmul.mubr.bf16.gmra.mrb[4].mxu0 %v417_v35  ;;  %v843_v29 = vpack.c.bf16 %v699_v20, %v695_v19 }
 0x121   : > { %1079 = vmatpush1.bf16.xpose.msra.mxu0 %v739_v38  ;;  %935 = vmatprep.mubr.bf16.mxu0 %v422_v42  ;;  %v523_v38 = vld [vmem:[%s3384_s28 + $0x170] sm:$0xff] }
 0x122   : > { %1312 = vmatmul.mubr.bf16.gmra.mrb[4].mxu1 %v417_v35  ;;  %1080 = vmatprep.subr.bf16.mxu0 %v744_v43  ;;  %v325_v35 = vld [vmem:[%s3374_s30 + $0x140] sm:$0xff]  ;;  %v755_v46 = vpack.c.bf16 %v523_v38, %v519_v37  ;;  %v680_v37 = vld [vmem:[%s3384_s28 + $0x658] sm:$0xff] }
 0x123   : > { %1465 = vmatpush1.bf16.xpose.msra.mxu1 %v803_v41  ;;  %1321 = vmatprep.mubr.bf16.mxu1 %v422_v42  ;;  %v334_v41 = vld [vmem:[%s3374_s30 + $0x188] sm:$0xff]  ;;  %v433_v43 = vpack.c.bf16 %v329_v36, %v325_v35  ;;  %v556_v35 = vld [vmem:[%s3384_s28 + $0x278] sm:$0xff] }
 0x124   : > { %1466 = vmatprep.subr.bf16.mxu1 %v808_v44  ;;  %v338_v42 = vld [vmem:[%s3374_s30 + $0x1a8] sm:$0xff]  ;;  %v528_v44 = vld [vmem:[%s3384_s28 + $0x198] sm:$0xff] }
 0x125   : > { %v438_v50 = vpack.c.bf16 %v338_v42, %v334_v41  ;;  %v760_v51 = vpack.c.bf16 %v532_v45, %v528_v44  ;;  %v684_v38 = vld [vmem:[%s3384_s28 + $0x678] sm:$0xff]  ;;  %v361_v44 = vld [vmem:[%s3374_s30 + $0x260] sm:$0xff]  ;;  %v551_v45 = vld [vmem:[%s3384_s28 + $0x250] sm:$0xff] }
 0x126   : > { %v836_v42 = vpack.c.bf16 %v684_v38, %v680_v37  ;;  %v703_v37 = vld [vmem:[%s3384_s28 + $0x710] sm:$0xff] }
 0x127   : > { %v707_v38 = vld [vmem:[%s3384_s28 + $0x730] sm:$0xff] }
 0x128   : > { %936 = vmatmul.mubr.bf16.gmra.mrb[8].mxu0 %v421_v53  ;;  %v847_v47 = vpack.c.bf16 %v707_v38, %v703_v37  ;;  %v296_v37 = vld [vmem:[%s3374_s30 + $0x58] sm:$0xff] }
 0x129   : > { %1081 = vmatpush1.bf16.xpose.msra.mxu0 %v743_v56  ;;  %945 = vmatprep.mubr.bf16.mxu0 %v426_v60  ;;  %v531_v56 = vld [vmem:[%s3384_s28 + $0x1b0] sm:$0xff]  ;;  %v300_v38 = vld [vmem:[%s3374_s30 + $0x78] sm:$0xff] }
 0x12a   : > { %1322 = vmatmul.mubr.bf16.gmra.mrb[8].mxu1 %v421_v53  ;;  %1082 = vmatprep.subr.bf16.mxu0 %v748_v61  ;;  %v333_v53 = vld [vmem:[%s3374_s30 + $0x180] sm:$0xff]  ;;  %v759_v0 = vpack.c.bf16 %v531_v56, %v527_v55  ;;  %v688_v55 = vld [vmem:[%s3384_s28 + $0x698] sm:$0xff] }
 0x12b   : > { %1467 = vmatpush1.bf16.xpose.msra.mxu1 %v807_v59  ;;  %1331 = vmatprep.mubr.bf16.mxu1 %v426_v60  ;;  %v342_v59 = vld [vmem:[%s3374_s30 + $0x1c8] sm:$0xff]  ;;  %v437_v61 = vpack.c.bf16 %v337_v54, %v333_v53  ;;  %v564_v53 = vld [vmem:[%s3384_s28 + $0x2b8] sm:$0xff] }
 0x12c   : > { %1468 = vmatprep.subr.bf16.mxu1 %v812_v62  ;;  %v346_v60 = vld [vmem:[%s3374_s30 + $0x1e8] sm:$0xff]  ;;  %v536_v62 = vld [vmem:[%s3384_s28 + $0x1d8] sm:$0xff] }
 0x12d   : > { %v442_v4 = vpack.c.bf16 %v346_v60, %v342_v59  ;;  %v764_v5 = vpack.c.bf16 %v540_v63, %v536_v62  ;;  %v692_v56 = vld [vmem:[%s3384_s28 + $0x6b8] sm:$0xff]  ;;  %v369_v62 = vld [vmem:[%s3374_s30 + $0x2a0] sm:$0xff]  ;;  %v559_v63 = vld [vmem:[%s3384_s28 + $0x290] sm:$0xff] }
 0x12e   : > { %v840_v60 = vpack.c.bf16 %v692_v56, %v688_v55  ;;  %v711_v55 = vld [vmem:[%s3384_s28 + $0x750] sm:$0xff] }
 0x12f   : > { %v715_v56 = vld [vmem:[%s3384_s28 + $0x770] sm:$0xff] }
 0x130   : > { %946 = vmatmul.mubr.bf16.gmra.mrb[12].mxu0 %v425_v7  ;;  %v851_v1 = vpack.c.bf16 %v715_v56, %v711_v55  ;;  %v320_v55 = vld [vmem:[%s3374_s30 + $0x118] sm:$0xff] }
 0x131   : > { %1083 = vmatpush1.bf16.xpose.msra.mxu0 %v747_v10  ;;  %955 = vmatprep.mubr.bf16.mxu0 %v430_v14  ;;  %v539_v10 = vld [vmem:[%s3384_s28 + $0x1f0] sm:$0xff]  ;;  %v324_v56 = vld [vmem:[%s3374_s30 + $0x138] sm:$0xff] }
 0x132   : > { %1332 = vmatmul.mubr.bf16.gmra.mrb[12].mxu1 %v425_v7  ;;  %1084 = vmatprep.subr.bf16.mxu0 %v752_v15  ;;  %v341_v7 = vld [vmem:[%s3374_s30 + $0x1c0] sm:$0xff]  ;;  %v763_v18 = vpack.c.bf16 %v539_v10, %v535_v9  ;;  %v696_v9 = vld [vmem:[%s3384_s28 + $0x6d8] sm:$0xff] }
 0x133   : > { %1469 = vmatpush1.bf16.xpose.msra.mxu1 %v811_v13  ;;  %1341 = vmatprep.mubr.bf16.mxu1 %v430_v14  ;;  %v350_v13 = vld [vmem:[%s3374_s30 + $0x208] sm:$0xff]  ;;  %v441_v15 = vpack.c.bf16 %v345_v8, %v341_v7  ;;  %v572_v7 = vld [vmem:[%s3384_s28 + $0x2f8] sm:$0xff] }
 0x134   : > { %1470 = vmatprep.subr.bf16.mxu1 %v816_v16  ;;  %v354_v14 = vld [vmem:[%s3374_s30 + $0x228] sm:$0xff]  ;;  %v544_v16 = vld [vmem:[%s3384_s28 + $0x218] sm:$0xff] }
 0x135   : > { %v446_v22 = vpack.c.bf16 %v354_v14, %v350_v13  ;;  %v768_v23 = vpack.c.bf16 %v548_v17, %v544_v16  ;;  %v700_v10 = vld [vmem:[%s3384_s28 + $0x6f8] sm:$0xff]  ;;  %v377_v16 = vld [vmem:[%s3374_s30 + $0x2e0] sm:$0xff]  ;;  %v567_v17 = vld [vmem:[%s3384_s28 + $0x2d0] sm:$0xff] }
 0x136   : > { %v844_v14 = vpack.c.bf16 %v700_v10, %v696_v9  ;;  %v719_v9 = vld [vmem:[%s3384_s28 + $0x790] sm:$0xff] }
 0x137   : > { %v723_v10 = vld [vmem:[%s3384_s28 + $0x7b0] sm:$0xff] }
 0x138   : > { %956 = vmatmul.mubr.bf16.gmra.mrb[16].mxu0 %v429_v25  ;;  %v855_v19 = vpack.c.bf16 %v723_v10, %v719_v9  ;;  %v344_v9 = vld [vmem:[%s3374_s30 + $0x1d8] sm:$0xff] }
 0x139   : > { %1085 = vmatpush1.bf16.xpose.msra.mxu0 %v751_v28  ;;  %965 = vmatprep.mubr.bf16.mxu0 %v434_v32  ;;  %v547_v28 = vld [vmem:[%s3384_s28 + $0x230] sm:$0xff]  ;;  %v348_v10 = vld [vmem:[%s3374_s30 + $0x1f8] sm:$0xff] }
 0x13a   : > { %1342 = vmatmul.mubr.bf16.gmra.mrb[16].mxu1 %v429_v25  ;;  %1086 = vmatprep.subr.bf16.mxu0 %v756_v33  ;;  %v349_v25 = vld [vmem:[%s3374_s30 + $0x200] sm:$0xff]  ;;  %v767_v36 = vpack.c.bf16 %v547_v28, %v543_v27  ;;  %v704_v27 = vld [vmem:[%s3384_s28 + $0x718] sm:$0xff] }
 0x13b   : > { %1471 = vmatpush1.bf16.xpose.msra.mxu1 %v815_v31  ;;  %1351 = vmatprep.mubr.bf16.mxu1 %v434_v32  ;;  %v358_v31 = vld [vmem:[%s3374_s30 + $0x248] sm:$0xff]  ;;  %v445_v33 = vpack.c.bf16 %v353_v26, %v349_v25  ;;  %v580_v25 = vld [vmem:[%s3384_s28 + $0x338] sm:$0xff] }
 0x13c   : > { %1472 = vmatprep.subr.bf16.mxu1 %v820_v34  ;;  %v362_v32 = vld [vmem:[%s3374_s30 + $0x268] sm:$0xff]  ;;  %v552_v34 = vld [vmem:[%s3384_s28 + $0x258] sm:$0xff] }
 0x13d   : > { %v450_v40 = vpack.c.bf16 %v362_v32, %v358_v31  ;;  %v772_v41 = vpack.c.bf16 %v556_v35, %v552_v34  ;;  %v708_v28 = vld [vmem:[%s3384_s28 + $0x738] sm:$0xff]  ;;  %v385_v34 = vld [vmem:[%s3374_s30 + $0x320] sm:$0xff]  ;;  %v575_v35 = vld [vmem:[%s3384_s28 + $0x310] sm:$0xff] }
 0x13e   : > { %v848_v32 = vpack.c.bf16 %v708_v28, %v704_v27  ;;  %v727_v27 = vld [vmem:[%s3384_s28 + $0x7d0] sm:$0xff] }
 0x13f   : > { %v731_v28 = vld [vmem:[%s3384_s28 + $0x7f0] sm:$0xff] }
 0x140   : > { %966 = vmatmul.mubr.bf16.gmra.mrb[20].mxu0 %v433_v43 }
 0x141   : > { %1087 = vmatpush1.bf16.xpose.msra.mxu0 %v755_v46  ;;  %975 = vmatprep.mubr.bf16.mxu0 %v438_v50  ;;  %v555_v46 = vld [vmem:[%s3384_s28 + $0x270] sm:$0xff] }
 0x142   : > { %1352 = vmatmul.mubr.bf16.gmra.mrb[20].mxu1 %v433_v43  ;;  %1088 = vmatprep.subr.bf16.mxu0 %v760_v51  ;;  %v357_v43 = vld [vmem:[%s3374_s30 + $0x240] sm:$0xff]  ;;  %v771_v54 = vpack.c.bf16 %v555_v46, %v551_v45  ;;  %v712_v45 = vld [vmem:[%s3384_s28 + $0x758] sm:$0xff] }
 0x143   : > { %1473 = vmatpush1.bf16.xpose.msra.mxu1 %v819_v49  ;;  %1361 = vmatprep.mubr.bf16.mxu1 %v438_v50  ;;  %v366_v49 = vld [vmem:[%s3374_s30 + $0x288] sm:$0xff]  ;;  %v449_v51 = vpack.c.bf16 %v361_v44, %v357_v43  ;;  %v588_v43 = vld [vmem:[%s3384_s28 + $0x378] sm:$0xff] }
 0x144   : > { %1474 = vmatprep.subr.bf16.mxu1 %v824_v52  ;;  %v370_v50 = vld [vmem:[%s3374_s30 + $0x2a8] sm:$0xff]  ;;  %v560_v52 = vld [vmem:[%s3384_s28 + $0x298] sm:$0xff] }
 0x145   : > { %v454_v58 = vpack.c.bf16 %v370_v50, %v366_v49  ;;  %v776_v59 = vpack.c.bf16 %v564_v53, %v560_v52  ;;  %v716_v46 = vld [vmem:[%s3384_s28 + $0x778] sm:$0xff]  ;;  %v393_v52 = vld [vmem:[%s3374_s30 + $0x360] sm:$0xff]  ;;  %v583_v53 = vld [vmem:[%s3384_s28 + $0x350] sm:$0xff] }
 0x146   : > { %v852_v50 = vpack.c.bf16 %v716_v46, %v712_v45 }
 0x148   : > { %976 = vmatmul.mubr.bf16.gmra.mrb[24].mxu0 %v437_v61 }
 0x149   : > { %1089 = vmatpush1.bf16.xpose.msra.mxu0 %v759_v0  ;;  %985 = vmatprep.mubr.bf16.mxu0 %v442_v4  ;;  %v563_v0 = vld [vmem:[%s3384_s28 + $0x2b0] sm:$0xff] }
 0x14a   : > { %1362 = vmatmul.mubr.bf16.gmra.mrb[24].mxu1 %v437_v61  ;;  %1090 = vmatprep.subr.bf16.mxu0 %v764_v5  ;;  %v365_v61 = vld [vmem:[%s3374_s30 + $0x280] sm:$0xff]  ;;  %v775_v8 = vpack.c.bf16 %v563_v0, %v559_v63  ;;  %v720_v63 = vld [vmem:[%s3384_s28 + $0x798] sm:$0xff] }
 0x14b   : > { %1475 = vmatpush1.bf16.xpose.msra.mxu1 %v823_v3  ;;  %1371 = vmatprep.mubr.bf16.mxu1 %v442_v4  ;;  %v374_v3 = vld [vmem:[%s3374_s30 + $0x2c8] sm:$0xff]  ;;  %v453_v5 = vpack.c.bf16 %v369_v62, %v365_v61  ;;  %v596_v61 = vld [vmem:[%s3384_s28 + $0x3b8] sm:$0xff] }
 0x14c   : > { %1476 = vmatprep.subr.bf16.mxu1 %v828_v6  ;;  %v378_v4 = vld [vmem:[%s3374_s30 + $0x2e8] sm:$0xff]  ;;  %v568_v6 = vld [vmem:[%s3384_s28 + $0x2d8] sm:$0xff] }
 0x14d   : > { %v458_v12 = vpack.c.bf16 %v378_v4, %v374_v3  ;;  %v780_v13 = vpack.c.bf16 %v572_v7, %v568_v6  ;;  %v724_v0 = vld [vmem:[%s3384_s28 + $0x7b8] sm:$0xff]  ;;  %v401_v6 = vld [vmem:[%s3374_s30 + $0x3a0] sm:$0xff]  ;;  %v591_v7 = vld [vmem:[%s3384_s28 + $0x390] sm:$0xff] }
 0x14e   : > { %v856_v4 = vpack.c.bf16 %v724_v0, %v720_v63 }
 0x150   : > { %986 = vmatmul.mubr.bf16.gmra.mrb[28].mxu0 %v441_v15 }
 0x151   : > { %1091 = vmatpush1.bf16.xpose.msra.mxu0 %v763_v18  ;;  %995 = vmatprep.mubr.bf16.mxu0 %v446_v22  ;;  %v571_v18 = vld [vmem:[%s3384_s28 + $0x2f0] sm:$0xff] }
 0x152   : > { %1372 = vmatmul.mubr.bf16.gmra.mrb[28].mxu1 %v441_v15  ;;  %1092 = vmatprep.subr.bf16.mxu0 %v768_v23  ;;  %v373_v15 = vld [vmem:[%s3374_s30 + $0x2c0] sm:$0xff]  ;;  %v779_v26 = vpack.c.bf16 %v571_v18, %v567_v17  ;;  %v728_v17 = vld [vmem:[%s3384_s28 + $0x7d8] sm:$0xff] }
 0x153   : > { %1477 = vmatpush1.bf16.xpose.msra.mxu1 %v827_v21  ;;  %1381 = vmatprep.mubr.bf16.mxu1 %v446_v22  ;;  %v382_v21 = vld [vmem:[%s3374_s30 + $0x308] sm:$0xff]  ;;  %v457_v23 = vpack.c.bf16 %v377_v16, %v373_v15  ;;  %v604_v15 = vld [vmem:[%s3384_s28 + $0x3f8] sm:$0xff] }
 0x154   : > { %1478 = vmatprep.subr.bf16.mxu1 %v832_v24  ;;  %v386_v22 = vld [vmem:[%s3374_s30 + $0x328] sm:$0xff]  ;;  %v576_v24 = vld [vmem:[%s3384_s28 + $0x318] sm:$0xff] }
 0x155   : > { %v462_v30 = vpack.c.bf16 %v386_v22, %v382_v21  ;;  %v784_v31 = vpack.c.bf16 %v580_v25, %v576_v24  ;;  %v732_v18 = vld [vmem:[%s3384_s28 + $0x7f8] sm:$0xff]  ;;  %v409_v24 = vld [vmem:[%s3374_s30 + $0x3e0] sm:$0xff]  ;;  %v599_v25 = vld [vmem:[%s3384_s28 + $0x3d0] sm:$0xff] }
 0x156   : > { %v860_v22 = vpack.c.bf16 %v732_v18, %v728_v17 }
 0x158   : > { %996 = vmatmul.mubr.bf16.gmra.mrb[32].mxu0 %v445_v33 }
 0x159   : > { %1093 = vmatpush1.bf16.xpose.msra.mxu0 %v767_v36  ;;  %1005 = vmatprep.mubr.bf16.mxu0 %v450_v40  ;;  %v579_v36 = vld [vmem:[%s3384_s28 + $0x330] sm:$0xff] }
 0x15a   : > { %1382 = vmatmul.mubr.bf16.gmra.mrb[32].mxu1 %v445_v33  ;;  %1094 = vmatprep.subr.bf16.mxu0 %v772_v41  ;;  %v381_v33 = vld [vmem:[%s3374_s30 + $0x300] sm:$0xff]  ;;  %v783_v44 = vpack.c.bf16 %v579_v36, %v575_v35  ;;  %v287_v35 = vld [vmem:[%s3374_s30 + $0x10] sm:$0xff] }
 0x15b   : > { %1479 = vmatpush1.bf16.xpose.msra.mxu1 %v831_v39  ;;  %1391 = vmatprep.mubr.bf16.mxu1 %v450_v40  ;;  %v390_v39 = vld [vmem:[%s3374_s30 + $0x348] sm:$0xff]  ;;  %v461_v41 = vpack.c.bf16 %v385_v34, %v381_v33  ;;  %v859_v33 = vpack.c.bf16 %v731_v28, %v727_v27  ;;  %v291_v36 = vld [vmem:[%s3374_s30 + $0x30] sm:$0xff]  ;;  %v368_v27 = vld [vmem:[%s3374_s30 + $0x298] sm:$0xff] }
 0x15c   : > { %1480 = vmatprep.subr.bf16.mxu1 %v836_v42  ;;  %v394_v40 = vld [vmem:[%s3374_s30 + $0x368] sm:$0xff]  ;;  %v584_v42 = vld [vmem:[%s3384_s28 + $0x358] sm:$0xff] }
 0x15d   : > { %v466_v48 = vpack.c.bf16 %v394_v40, %v390_v39  ;;  %v788_v49 = vpack.c.bf16 %v588_v43, %v584_v42  ;;  %v415_v39 = vpack.c.bf16 %v291_v36, %v287_v35  ;;  %v420_v40 = vpack.c.bf16 %v300_v38, %v296_v37  ;;  %v299_v42 = vld [vmem:[%s3374_s30 + $0x70] sm:$0xff]  ;;  %v304_v43 = vld [vmem:[%s3374_s30 + $0x98] sm:$0xff] }
 0x15e   : > { %v372_v28 = vld [vmem:[%s3374_s30 + $0x2b8] sm:$0xff]  ;;  %v375_v37 = vld [vmem:[%s3374_s30 + $0x2d0] sm:$0xff] }
 0x15f   : > { %v379_v38 = vld [vmem:[%s3374_s30 + $0x2f0] sm:$0xff] }
 0x160   : > { %1006 = vmatmul.mubr.bf16.gmra.mrb[36].mxu0 %v449_v51 }
 0x161   : > { %1095 = vmatpush1.bf16.xpose.msra.mxu0 %v771_v54  ;;  %1015 = vmatprep.mubr.bf16.mxu0 %v454_v58  ;;  %v587_v54 = vld [vmem:[%s3384_s28 + $0x370] sm:$0xff] }
 0x162   : > { %1392 = vmatmul.mubr.bf16.gmra.mrb[36].mxu1 %v449_v51  ;;  %1096 = vmatprep.subr.bf16.mxu0 %v776_v59  ;;  %v389_v51 = vld [vmem:[%s3374_s30 + $0x340] sm:$0xff]  ;;  %v787_v62 = vpack.c.bf16 %v587_v54, %v583_v53  ;;  %v311_v53 = vld [vmem:[%s3374_s30 + $0xd0] sm:$0xff] }
 0x163   : > { %1481 = vmatpush1.bf16.xpose.msra.mxu1 %v835_v57  ;;  %1401 = vmatprep.mubr.bf16.mxu1 %v454_v58  ;;  %v398_v57 = vld [vmem:[%s3374_s30 + $0x388] sm:$0xff]  ;;  %v465_v59 = vpack.c.bf16 %v393_v52, %v389_v51  ;;  %v315_v54 = vld [vmem:[%s3374_s30 + $0xf0] sm:$0xff] }
 0x164   : > { %1482 = vmatprep.subr.bf16.mxu1 %v840_v60  ;;  %v402_v58 = vld [vmem:[%s3374_s30 + $0x3a8] sm:$0xff]  ;;  %v592_v60 = vld [vmem:[%s3384_s28 + $0x398] sm:$0xff] }
 0x165   : > { %v470_v2 = vpack.c.bf16 %v402_v58, %v398_v57  ;;  %v792_v3 = vpack.c.bf16 %v596_v61, %v592_v60  ;;  %v427_v57 = vpack.c.bf16 %v315_v54, %v311_v53  ;;  %v432_v58 = vpack.c.bf16 %v324_v56, %v320_v55  ;;  %v323_v60 = vld [vmem:[%s3374_s30 + $0x130] sm:$0xff]  ;;  %v328_v61 = vld [vmem:[%s3374_s30 + $0x158] sm:$0xff] }
 0x166   : > { %v399_v55 = vld [vmem:[%s3374_s30 + $0x390] sm:$0xff] }
 0x167   : > { %v403_v56 = vld [vmem:[%s3374_s30 + $0x3b0] sm:$0xff] }
 0x168   : > { %1016 = vmatmul.mubr.bf16.gmra.mrb[40].mxu0 %v453_v5 }
 0x169   : > { %1097 = vmatpush1.bf16.xpose.msra.mxu0 %v775_v8  ;;  %1025 = vmatprep.mubr.bf16.mxu0 %v458_v12  ;;  %v595_v8 = vld [vmem:[%s3384_s28 + $0x3b0] sm:$0xff] }
 0x16a   : > { %1402 = vmatmul.mubr.bf16.gmra.mrb[40].mxu1 %v453_v5  ;;  %1098 = vmatprep.subr.bf16.mxu0 %v780_v13  ;;  %v397_v5 = vld [vmem:[%s3374_s30 + $0x380] sm:$0xff]  ;;  %v791_v16 = vpack.c.bf16 %v595_v8, %v591_v7  ;;  %v335_v7 = vld [vmem:[%s3374_s30 + $0x190] sm:$0xff] }
 0x16b   : > { %1483 = vmatpush1.bf16.xpose.msra.mxu1 %v839_v11  ;;  %1411 = vmatprep.mubr.bf16.mxu1 %v458_v12  ;;  %v406_v11 = vld [vmem:[%s3374_s30 + $0x3c8] sm:$0xff]  ;;  %v469_v13 = vpack.c.bf16 %v401_v6, %v397_v5  ;;  %v339_v8 = vld [vmem:[%s3374_s30 + $0x1b0] sm:$0xff] }
 0x16c   : > { %1484 = vmatprep.subr.bf16.mxu1 %v844_v14  ;;  %v410_v12 = vld [vmem:[%s3374_s30 + $0x3e8] sm:$0xff]  ;;  %v600_v14 = vld [vmem:[%s3384_s28 + $0x3d8] sm:$0xff] }
 0x16d   : > { %v474_v20 = vpack.c.bf16 %v410_v12, %v406_v11  ;;  %v796_v21 = vpack.c.bf16 %v604_v15, %v600_v14  ;;  %v439_v11 = vpack.c.bf16 %v339_v8, %v335_v7  ;;  %v444_v12 = vpack.c.bf16 %v348_v10, %v344_v9  ;;  %v347_v14 = vld [vmem:[%s3374_s30 + $0x1f0] sm:$0xff]  ;;  %v352_v15 = vld [vmem:[%s3374_s30 + $0x218] sm:$0xff] }
 0x170   : > { %1026 = vmatmul.mubr.bf16.gmra.mrb[44].mxu0 %v457_v23 }
 0x171   : > { %1099 = vmatpush1.bf16.xpose.msra.mxu0 %v779_v26  ;;  %1035 = vmatprep.mubr.bf16.mxu0 %v462_v30  ;;  %v603_v26 = vld [vmem:[%s3384_s28 + $0x3f0] sm:$0xff]  ;;  %s3055_s28 = smov [#allocation8]  }
 0x172   : > { %1412 = vmatmul.mubr.bf16.gmra.mrb[44].mxu1 %v457_v23  ;;  %1100 = vmatprep.subr.bf16.mxu0 %v784_v31  ;;  %v405_v23 = vld [vmem:[%s3374_s30 + $0x3c0] sm:$0xff]  ;;  %s2902_s4 = sshll.u32 %s3055_s28, 4  ;;  %s2903_s4 = int_to_ptr.vmem [resolvable:$false] %s2902_s4 }
 0x173   : > { %1485 = vmatpush1.bf16.xpose.msra.mxu1 %v843_v29  ;;  %1421 = vmatprep.mubr.bf16.mxu1 %v462_v30  ;;  %v288_v29 = vld [vmem:[%s3374_s30 + $0x18] sm:$0xff]  ;;  %v473_v31 = vpack.c.bf16 %v409_v24, %v405_v23  ;;  %p2905_p11 = scmp.lt.s32.totalorder %s3986_s3, %s2903_s4 }
 0x174   : > { %1486 = vmatprep.subr.bf16.mxu1 %v848_v32  ;;  %v292_v30 = vld [vmem:[%s3374_s30 + $0x38] sm:$0xff]  ;;  %v795_v32 = vpack.c.bf16 %v603_v26, %v599_v25  ;;  %v359_v25 = vld [vmem:[%s3374_s30 + $0x250] sm:$0xff] }
 0x175   : > { %v416_v34 = vpack.c.bf16 %v292_v30, %v288_v29  ;;  %v363_v26 = vld [vmem:[%s3374_s30 + $0x270] sm:$0xff]  ;;  %v456_v30 = vpack.c.bf16 %v372_v28, %v368_v27 }
 0x176   : > { %v451_v29 = vpack.c.bf16 %v363_v26, %v359_v25 }
 0x178   : > { %1036 = vmatmul.mubr.bf16.gmra.mrb[48].mxu0 %v461_v41 }
 0x179   : > { %1101 = vmatpush1.bf16.xpose.msra.mxu0 %v783_v44  ;;  %1045 = vmatprep.mubr.bf16.mxu0 %v466_v48  ;;  %v308_v44 = vld [vmem:[%s3374_s30 + $0xb8] sm:$0xff] }
 0x17a   : > { %1422 = vmatmul.mubr.bf16.gmra.mrb[48].mxu1 %v461_v41  ;;  %1102 = vmatprep.subr.bf16.mxu0 %v788_v49  ;;  %v295_v41 = vld [vmem:[%s3374_s30 + $0x50] sm:$0xff]  ;;  %v424_v46 = vpack.c.bf16 %v308_v44, %v304_v43  ;;  %v312_v49 = vld [vmem:[%s3374_s30 + $0xd8] sm:$0xff] }
 0x17b   : > { %1487 = vmatpush1.bf16.xpose.msra.mxu1 %v847_v47  ;;  %1431 = vmatprep.mubr.bf16.mxu1 %v466_v48  ;;  %v419_v45 = vpack.c.bf16 %v299_v42, %v295_v41  ;;  %v303_v47 = vld [vmem:[%s3374_s30 + $0x90] sm:$0xff]  ;;  %v459_v41 = vpack.c.bf16 %v379_v38, %v375_v37 }
 0x17c   : > { %1488 = vmatprep.subr.bf16.mxu1 %v852_v50  ;;  %v307_v48 = vld [vmem:[%s3374_s30 + $0xb0] sm:$0xff]  ;;  %v316_v50 = vld [vmem:[%s3374_s30 + $0xf8] sm:$0xff] }
 0x17d   : > { %v423_v51 = vpack.c.bf16 %v307_v48, %v303_v47  ;;  %v428_v52 = vpack.c.bf16 %v316_v50, %v312_v49  ;;  %v383_v43 = vld [vmem:[%s3374_s30 + $0x310] sm:$0xff] }
 0x17e   : > { %v387_v44 = vld [vmem:[%s3374_s30 + $0x330] sm:$0xff] }
 0x17f   : > { %v463_v47 = vpack.c.bf16 %v387_v44, %v383_v43  ;;  %v391_v49 = vld [vmem:[%s3374_s30 + $0x350] sm:$0xff] }
 0x180   : > { %1046 = vmatmul.mubr.bf16.gmra.mrb[52].mxu0 %v465_v59  ;;  %v395_v50 = vld [vmem:[%s3374_s30 + $0x370] sm:$0xff] }
 0x181   : > { %1103 = vmatpush1.bf16.xpose.msra.mxu0 %v787_v62  ;;  %1055 = vmatprep.mubr.bf16.mxu0 %v470_v2  ;;  %v332_v62 = vld [vmem:[%s3374_s30 + $0x178] sm:$0xff]  ;;  %v467_v53 = vpack.c.bf16 %v395_v50, %v391_v49 }
 0x182   : > { %1432 = vmatmul.mubr.bf16.gmra.mrb[52].mxu1 %v465_v59  ;;  %1104 = vmatprep.subr.bf16.mxu0 %v792_v3  ;;  %v319_v59 = vld [vmem:[%s3374_s30 + $0x110] sm:$0xff]  ;;  %v436_v0 = vpack.c.bf16 %v332_v62, %v328_v61  ;;  %v336_v3 = vld [vmem:[%s3374_s30 + $0x198] sm:$0xff] }
 0x183   : > { %1489 = vmatpush1.bf16.xpose.msra.mxu1 %v851_v1  ;;  %1441 = vmatprep.mubr.bf16.mxu1 %v470_v2  ;;  %v431_v63 = vpack.c.bf16 %v323_v60, %v319_v59  ;;  %v327_v1 = vld [vmem:[%s3374_s30 + $0x150] sm:$0xff]  ;;  %v471_v59 = vpack.c.bf16 %v403_v56, %v399_v55 }
 0x184   : > { %1490 = vmatprep.subr.bf16.mxu1 %v856_v4  ;;  %v331_v2 = vld [vmem:[%s3374_s30 + $0x170] sm:$0xff]  ;;  %v340_v4 = vld [vmem:[%s3374_s30 + $0x1b8] sm:$0xff] }
 0x185   : > { %v435_v5 = vpack.c.bf16 %v331_v2, %v327_v1  ;;  %v440_v6 = vpack.c.bf16 %v340_v4, %v336_v3  ;;  %v407_v61 = vld [vmem:[%s3374_s30 + $0x3d0] sm:$0xff]  ;;  %v861_v3 = vld [vmem:[%s247_s5] sm:$0xf]  ;;  %s2904_s5 = scalar_lea.vmem %s2903_s4, 16384 }
 0x186   : > { %v411_v62 = vld [vmem:[%s3374_s30 + $0x3f0] sm:$0xff]  ;;  %p2906_p13 = scmp.lt.s32.totalorder %s2904_s5, %s2898_s27 }
 0x188   : > { %1056 = vmatmul.mubr.bf16.gmra.mrb[56].mxu0 %v469_v13  ;;  %p2907_p3 = por %p2906_p13, %p2905_p11 }
 0x189   : > { %1105 = vmatpush1.bf16.xpose.msra.mxu0 %v791_v16  ;;  %1065 = vmatprep.mubr.bf16.mxu0 %v474_v20  ;;  %v356_v16 = vld [vmem:[%s3374_s30 + $0x238] sm:$0xff] }
 0x18a   : > { %1442 = vmatmul.mubr.bf16.gmra.mrb[56].mxu1 %v469_v13  ;;  %1106 = vmatprep.subr.bf16.mxu0 %v796_v21  ;;  %v343_v13 = vld [vmem:[%s3374_s30 + $0x1d0] sm:$0xff]  ;;  %v448_v18 = vpack.c.bf16 %v356_v16, %v352_v15  ;;  %v360_v21 = vld [vmem:[%s3374_s30 + $0x258] sm:$0xff]  ;;  %p2908_p8 = pnand %p2907_p3, %p2901_p4 }
 0x18b   : > { %1491 = vmatpush1.bf16.xpose.msra.mxu1 %v855_v19  ;;  %1451 = vmatprep.mubr.bf16.mxu1 %v474_v20  ;;  %v443_v17 = vpack.c.bf16 %v347_v14, %v343_v13  ;;  %v351_v19 = vld [vmem:[%s3374_s30 + $0x210] sm:$0xff] }
 0x18c   : > { %1492 = vmatprep.subr.bf16.mxu1 %v860_v22  ;;  %v355_v20 = vld [vmem:[%s3374_s30 + $0x230] sm:$0xff]  ;;  %v364_v22 = vld [vmem:[%s3374_s30 + $0x278] sm:$0xff] }
 0x18d   : > { %v447_v23 = vpack.c.bf16 %v355_v20, %v351_v19  ;;  %v452_v24 = vpack.c.bf16 %v364_v22, %v360_v21 }
 0x190   : > { %1066 = vmatmul.mubr.bf16.gmra.mrb[60].mxu0 %v473_v31 }
 0x191   : > { %1107 = vmatpush1.bf16.xpose.msra.mxu0 %v795_v32  ;;  %1108 = vmatprep.mubr.bf16.mxu0 %v416_v34  ;;  %v371_v32 = vld [vmem:[%s3374_s30 + $0x2b0] sm:$0xff] }
 0x192   : > { %1452 = vmatmul.mubr.bf16.gmra.mrb[60].mxu1 %v473_v31  ;;  %v367_v31 = vld [vmem:[%s3374_s30 + $0x290] sm:$0xff] }
 0x193   : > { %1493 = vmatpush1.bf16.xpose.msra.mxu1 %v859_v33  ;;  %1494 = vmatprep.mubr.bf16.mxu1 %v416_v34  ;;  %v376_v33 = vld [vmem:[%s3374_s30 + $0x2d8] sm:$0xff]  ;;  %v455_v35 = vpack.c.bf16 %v371_v32, %v367_v31 }
 0x194   : > { %v380_v34 = vld [vmem:[%s3374_s30 + $0x2f8] sm:$0xff] }
 0x195   : > { %v460_v36 = vpack.c.bf16 %v380_v34, %v376_v33 }
 0x198   : > { %1109 = vmatmul.mubr.bf16.vlgmr.msra.gmra.mrb[0].mxu0 %v415_v39 }
 0x199   : > { %1118 = vmatprep.mubr.bf16.mxu0 %v420_v40 }
 0x19a   : > { %1495 = vmatmul.mubr.bf16.vlgmr.msra.gmra.mrb[0].mxu1 %v415_v39  ;;  %v384_v39 = vld [vmem:[%s3374_s30 + $0x318] sm:$0xff] }
 0x19b   : > { %1504 = vmatprep.mubr.bf16.mxu1 %v420_v40  ;;  %v388_v40 = vld [vmem:[%s3374_s30 + $0x338] sm:$0xff] }
 0x19c   : > { %v464_v42 = vpack.c.bf16 %v388_v40, %v384_v39 }
 0x1a0   : > { %1119 = vmatmul.mubr.bf16.gmra.mrb[4].mxu0 %v419_v45 }
 0x1a1   : > { %1128 = vmatprep.mubr.bf16.mxu0 %v424_v46 }
 0x1a2   : > { %1505 = vmatmul.mubr.bf16.gmra.mrb[4].mxu1 %v419_v45  ;;  %v392_v45 = vld [vmem:[%s3374_s30 + $0x358] sm:$0xff] }
 0x1a3   : > { %1514 = vmatprep.mubr.bf16.mxu1 %v424_v46  ;;  %v396_v46 = vld [vmem:[%s3374_s30 + $0x378] sm:$0xff] }
 0x1a4   : > { %v468_v48 = vpack.c.bf16 %v396_v46, %v392_v45 }
 0x1a8   : > { %1129 = vmatmul.mubr.bf16.gmra.mrb[8].mxu0 %v423_v51 }
 0x1a9   : > { %1138 = vmatprep.mubr.bf16.mxu0 %v428_v52 }
 0x1aa   : > { %1515 = vmatmul.mubr.bf16.gmra.mrb[8].mxu1 %v423_v51  ;;  %v400_v51 = vld [vmem:[%s3374_s30 + $0x398] sm:$0xff] }
 0x1ab   : > { %1524 = vmatprep.mubr.bf16.mxu1 %v428_v52  ;;  %v404_v52 = vld [vmem:[%s3374_s30 + $0x3b8] sm:$0xff] }
 0x1ac   : > { %v472_v54 = vpack.c.bf16 %v404_v52, %v400_v51 }
 0x1b0   : > { %1139 = vmatmul.mubr.bf16.gmra.mrb[12].mxu0 %v427_v57 }
 0x1b1   : > { %1148 = vmatprep.mubr.bf16.mxu0 %v432_v58 }
 0x1b2   : > { %1525 = vmatmul.mubr.bf16.gmra.mrb[12].mxu1 %v427_v57  ;;  %v408_v57 = vld [vmem:[%s3374_s30 + $0x3d8] sm:$0xff] }
 0x1b3   : > { %1534 = vmatprep.mubr.bf16.mxu1 %v432_v58  ;;  %v412_v58 = vld [vmem:[%s3374_s30 + $0x3f8] sm:$0xff] }
 0x1b4   : > { %v476_v60 = vpack.c.bf16 %v412_v58, %v408_v57 }
 0x1b8   : > { %1149 = vmatmul.mubr.bf16.gmra.mrb[16].mxu0 %v431_v63 }
 0x1b9   : > { %1158 = vmatprep.mubr.bf16.mxu0 %v436_v0 }
 0x1ba   : > { %1535 = vmatmul.mubr.bf16.gmra.mrb[16].mxu1 %v431_v63  ;;  %v475_v63 = vpack.c.bf16 %v411_v62, %v407_v61 }
 0x1bb   : > { %1544 = vmatprep.mubr.bf16.mxu1 %v436_v0  ;;  %v863_v0 = vlaneseq }
 0x1bd   : > { %v864_v1 = vshrl.u32 %v863_v0, 7 }
 0x1bf   : > { %v865_v2 = vsub.s32 0, %v864_v1  ;;  %v873_v4 = vsub.s32 2, %v864_v1 }
 0x1c0   : > { %1159 = vmatmul.mubr.bf16.gmra.mrb[20].mxu0 %v435_v5 }
 0x1c1   : > { %1168 = vmatprep.mubr.bf16.mxu0 %v440_v6  ;;  %v3776_v7 = vrot.slane %v861_v3, %v865_v2  ;;  %v3779_v8 = vrot.slane %v861_v3, %v873_v4 }
 0x1c2   : > { %1545 = vmatmul.mubr.bf16.gmra.mrb[20].mxu1 %v435_v5  ;;  %v869_v5 = vsub.s32 1, %v864_v1 }
 0x1c3   : > { %1554 = vmatprep.mubr.bf16.mxu1 %v440_v6  ;;  %v877_v6 = vsub.s32 3, %v864_v1 }
 0x1c4   : > { %v3781_v9 = vrot.slane %v861_v3, %v869_v5 }
 0x1c5   : > { %v3783_v10 = vrot.slane %v861_v3, %v877_v6 }
 0x1c8   : > { %1169 = vmatmul.mubr.bf16.gmra.mrb[24].mxu0 %v439_v11 }
 0x1c9   : > { %1178 = vmatprep.mubr.bf16.mxu0 %v444_v12 }
 0x1ca   : > { %1555 = vmatmul.mubr.bf16.gmra.mrb[24].mxu1 %v439_v11 }
 0x1cb   : > { %1564 = vmatprep.mubr.bf16.mxu1 %v444_v12 }
 0x1d0   : > { %1179 = vmatmul.mubr.bf16.gmra.mrb[28].mxu0 %v443_v17 }
 0x1d1   : > { %1188 = vmatprep.mubr.bf16.mxu0 %v448_v18 }
 0x1d2   : > { %1565 = vmatmul.mubr.bf16.gmra.mrb[28].mxu1 %v443_v17 }
 0x1d3   : > { %1574 = vmatprep.mubr.bf16.mxu1 %v448_v18 }
 0x1d8   : > { %1189 = vmatmul.mubr.bf16.gmra.mrb[32].mxu0 %v447_v23 }
 0x1d9   : > { %1198 = vmatprep.mubr.bf16.mxu0 %v452_v24 }
 0x1da   : > { %1575 = vmatmul.mubr.bf16.gmra.mrb[32].mxu1 %v447_v23 }
 0x1db   : > { %1584 = vmatprep.mubr.bf16.mxu1 %v452_v24 }
 0x1e0   : > { %1199 = vmatmul.mubr.bf16.gmra.mrb[36].mxu0 %v451_v29 }
 0x1e1   : > { %1208 = vmatprep.mubr.bf16.mxu0 %v456_v30 }
 0x1e2   : > { %1585 = vmatmul.mubr.bf16.gmra.mrb[36].mxu1 %v451_v29 }
 0x1e3   : > { %1594 = vmatprep.mubr.bf16.mxu1 %v456_v30 }
 0x1e8   : > { %1209 = vmatmul.mubr.bf16.gmra.mrb[40].mxu0 %v455_v35 }
 0x1e9   : > { %1218 = vmatprep.mubr.bf16.mxu0 %v460_v36 }
 0x1ea   : > { %1595 = vmatmul.mubr.bf16.gmra.mrb[40].mxu1 %v455_v35 }
 0x1eb   : > { %1604 = vmatprep.mubr.bf16.mxu1 %v460_v36 }
 0x1f0   : > { %1219 = vmatmul.mubr.bf16.gmra.mrb[44].mxu0 %v459_v41 }
 0x1f1   : > { %1228 = vmatprep.mubr.bf16.mxu0 %v464_v42 }
 0x1f2   : > { %1605 = vmatmul.mubr.bf16.gmra.mrb[44].mxu1 %v459_v41 }
 0x1f3   : > { %1614 = vmatprep.mubr.bf16.mxu1 %v464_v42 }
 0x1f8   : > { %1229 = vmatmul.mubr.bf16.gmra.mrb[48].mxu0 %v463_v47 }
 0x1f9   : > { %1238 = vmatprep.mubr.bf16.mxu0 %v468_v48 }
 0x1fa   : > { %1615 = vmatmul.mubr.bf16.gmra.mrb[48].mxu1 %v463_v47 }
 0x1fb   : > { %1624 = vmatprep.mubr.bf16.mxu1 %v468_v48 }
 0x200   : > { %1239 = vmatmul.mubr.bf16.gmra.mrb[52].mxu0 %v467_v53 }
 0x201   : > { %1248 = vmatprep.mubr.bf16.mxu0 %v472_v54 }
 0x202   : > { %1625 = vmatmul.mubr.bf16.gmra.mrb[52].mxu1 %v467_v53 }
 0x203   : > { %1634 = vmatprep.mubr.bf16.mxu1 %v472_v54 }
 0x208   : > { %1249 = vmatmul.mubr.bf16.gmra.mrb[56].mxu0 %v471_v59 }
 0x209   : > { %1258 = vmatprep.mubr.bf16.mxu0 %v476_v60 }
 0x20a   : > { %1635 = vmatmul.mubr.bf16.gmra.mrb[56].mxu1 %v471_v59 }
 0x20b   : > { %1644 = vmatprep.mubr.bf16.mxu1 %v476_v60 }
 0x210   : > { %1259 = vmatmul.mubr.bf16.gmra.mrb[60].mxu0 %v475_v63 }
 0x212   : > { %1645 = vmatmul.mubr.bf16.gmra.mrb[60].mxu1 %v475_v63 }
 0x26b   : > { %v1110_v11 = vpop.f32.mrb[0].mxu0 }
 0x26c   : > { %v2410_v12 = vadd.f32 %v1110_v11, %v3776_v7  ;;  %v1112_v14 = vpop.f32.mrb[1].mxu0 }
 0x26d   : > { %v1496_v13 = vpop.f32.mrb[0].mxu1  ;;  %v2411_v16 = vadd.f32 %v1112_v14, %v3781_v9  ;;  %v1114_v18 = vpop.f32.mrb[2].mxu0 }
 0x26e   : > { %v2474_v15 = vadd.f32 %v1496_v13, %v3779_v8  ;;  %v1498_v17 = vpop.f32.mrb[1].mxu1  ;;  %v2412_v20 = vadd.f32 %v1114_v18, %v3776_v7  ;;  %v1116_v22 = vpop.f32.mrb[3].mxu0 }
 0x26f   : > { %v2475_v19 = vadd.f32 %v1498_v17, %v3783_v10  ;;  %v1500_v21 = vpop.f32.mrb[2].mxu1  ;;  %v2346_v23 = vpack.c.bf16 %v2411_v16, %v2410_v12  ;;  %v2413_v25 = vadd.f32 %v1116_v22, %v3781_v9 }
 0x270   : > { %v2476_v24 = vadd.f32 %v1500_v21, %v3779_v8  ;;  %v1502_v26 = vpop.f32.mrb[3].mxu1 }
 0x271   : > { %v2347_v27 = vpack.c.bf16 %v2475_v19, %v2474_v15  ;;  %v2477_v28 = vadd.f32 %v1502_v26, %v3783_v10  ;;  %2039 = vst [vmem:[%s3795_s20] sm:$0xff] %v2346_v23  ;;  %v2348_v29 = vpack.c.bf16 %v2413_v25, %v2412_v20 }
 0x273   : > { %2040 = vst [vmem:[%s3795_s20 + $0x8] sm:$0xff] %v2347_v27  ;;  %v2349_v30 = vpack.c.bf16 %v2477_v28, %v2476_v24  ;;  %2041 = vst [vmem:[%s3795_s20 + $0x10] sm:$0xff] %v2348_v29  ;;  %v1120_v31 = vpop.f32.mrb[4].mxu0 }
 0x274   : > { %v2414_v32 = vadd.f32 %v1120_v31, %v3776_v7  ;;  %v1122_v34 = vpop.f32.mrb[5].mxu0 }
 0x275   : > { %2042 = vst [vmem:[%s3795_s20 + $0x18] sm:$0xff] %v2349_v30  ;;  %v1506_v33 = vpop.f32.mrb[4].mxu1  ;;  %v2415_v36 = vadd.f32 %v1122_v34, %v3781_v9  ;;  %v1124_v38 = vpop.f32.mrb[6].mxu0 }
 0x276   : > { %v2478_v35 = vadd.f32 %v1506_v33, %v3779_v8  ;;  %v1508_v37 = vpop.f32.mrb[5].mxu1  ;;  %v2416_v40 = vadd.f32 %v1124_v38, %v3776_v7  ;;  %v1126_v42 = vpop.f32.mrb[7].mxu0 }
 0x277   : > { %v2479_v39 = vadd.f32 %v1508_v37, %v3783_v10  ;;  %v1510_v41 = vpop.f32.mrb[6].mxu1  ;;  %v2350_v43 = vpack.c.bf16 %v2415_v36, %v2414_v32  ;;  %v2417_v45 = vadd.f32 %v1126_v42, %v3781_v9 }
 0x278   : > { %v2480_v44 = vadd.f32 %v1510_v41, %v3779_v8  ;;  %v1512_v46 = vpop.f32.mrb[7].mxu1 }
 0x279   : > { %v2351_v47 = vpack.c.bf16 %v2479_v39, %v2478_v35  ;;  %v2481_v48 = vadd.f32 %v1512_v46, %v3783_v10  ;;  %2043 = vst [vmem:[%s3795_s20 + $0x20] sm:$0xff] %v2350_v43  ;;  %v2352_v49 = vpack.c.bf16 %v2417_v45, %v2416_v40 }
 0x27b   : > { %2044 = vst [vmem:[%s3795_s20 + $0x28] sm:$0xff] %v2351_v47  ;;  %v2353_v50 = vpack.c.bf16 %v2481_v48, %v2480_v44  ;;  %2045 = vst [vmem:[%s3795_s20 + $0x30] sm:$0xff] %v2352_v49  ;;  %v1130_v51 = vpop.f32.mrb[8].mxu0 }
 0x27c   : > { %v2418_v52 = vadd.f32 %v1130_v51, %v3776_v7  ;;  %v1132_v54 = vpop.f32.mrb[9].mxu0 }
 0x27d   : > { %2046 = vst [vmem:[%s3795_s20 + $0x38] sm:$0xff] %v2353_v50  ;;  %v1516_v53 = vpop.f32.mrb[8].mxu1  ;;  %v2419_v56 = vadd.f32 %v1132_v54, %v3781_v9  ;;  %v1134_v58 = vpop.f32.mrb[10].mxu0 }
 0x27e   : > { %v2482_v55 = vadd.f32 %v1516_v53, %v3779_v8  ;;  %v1518_v57 = vpop.f32.mrb[9].mxu1  ;;  %v2420_v60 = vadd.f32 %v1134_v58, %v3776_v7  ;;  %v1136_v62 = vpop.f32.mrb[11].mxu0 }
 0x27f   : > { %v2483_v59 = vadd.f32 %v1518_v57, %v3783_v10  ;;  %v1520_v61 = vpop.f32.mrb[10].mxu1  ;;  %v2354_v63 = vpack.c.bf16 %v2419_v56, %v2418_v52  ;;  %v2421_v1 = vadd.f32 %v1136_v62, %v3781_v9 }
 0x280   : > { %v2484_v0 = vadd.f32 %v1520_v61, %v3779_v8  ;;  %v1522_v2 = vpop.f32.mrb[11].mxu1 }
 0x281   : > { %v2355_v3 = vpack.c.bf16 %v2483_v59, %v2482_v55  ;;  %v2485_v4 = vadd.f32 %v1522_v2, %v3783_v10  ;;  %2047 = vst [vmem:[%s3795_s20 + $0x40] sm:$0xff] %v2354_v63  ;;  %v2356_v5 = vpack.c.bf16 %v2421_v1, %v2420_v60 }
 0x283   : > { %2048 = vst [vmem:[%s3795_s20 + $0x48] sm:$0xff] %v2355_v3  ;;  %v2357_v6 = vpack.c.bf16 %v2485_v4, %v2484_v0  ;;  %2049 = vst [vmem:[%s3795_s20 + $0x50] sm:$0xff] %v2356_v5  ;;  %v1140_v11 = vpop.f32.mrb[12].mxu0 }
 0x284   : > { %v2422_v12 = vadd.f32 %v1140_v11, %v3776_v7  ;;  %v1142_v14 = vpop.f32.mrb[13].mxu0 }
 0x285   : > { %2050 = vst [vmem:[%s3795_s20 + $0x58] sm:$0xff] %v2357_v6  ;;  %v1526_v13 = vpop.f32.mrb[12].mxu1  ;;  %v2423_v16 = vadd.f32 %v1142_v14, %v3781_v9  ;;  %v1144_v18 = vpop.f32.mrb[14].mxu0 }
 0x286   : > { %v2486_v15 = vadd.f32 %v1526_v13, %v3779_v8  ;;  %v1528_v17 = vpop.f32.mrb[13].mxu1  ;;  %v2424_v20 = vadd.f32 %v1144_v18, %v3776_v7  ;;  %v1146_v22 = vpop.f32.mrb[15].mxu0 }
 0x287   : > { %v2487_v19 = vadd.f32 %v1528_v17, %v3783_v10  ;;  %v1530_v21 = vpop.f32.mrb[14].mxu1  ;;  %v2358_v23 = vpack.c.bf16 %v2423_v16, %v2422_v12  ;;  %v2425_v25 = vadd.f32 %v1146_v22, %v3781_v9 }
 0x288   : > { %v2488_v24 = vadd.f32 %v1530_v21, %v3779_v8  ;;  %v1532_v26 = vpop.f32.mrb[15].mxu1 }
 0x289   : > { %v2359_v27 = vpack.c.bf16 %v2487_v19, %v2486_v15  ;;  %v2489_v28 = vadd.f32 %v1532_v26, %v3783_v10  ;;  %2051 = vst [vmem:[%s3795_s20 + $0x60] sm:$0xff] %v2358_v23  ;;  %v2360_v29 = vpack.c.bf16 %v2425_v25, %v2424_v20 }
 0x28b   : > { %2052 = vst [vmem:[%s3795_s20 + $0x68] sm:$0xff] %v2359_v27  ;;  %v2361_v30 = vpack.c.bf16 %v2489_v28, %v2488_v24  ;;  %2053 = vst [vmem:[%s3795_s20 + $0x70] sm:$0xff] %v2360_v29  ;;  %v1150_v31 = vpop.f32.mrb[16].mxu0 }
 0x28c   : > { %v2426_v32 = vadd.f32 %v1150_v31, %v3776_v7  ;;  %v1152_v34 = vpop.f32.mrb[17].mxu0 }
 0x28d   : > { %2054 = vst [vmem:[%s3795_s20 + $0x78] sm:$0xff] %v2361_v30  ;;  %v1536_v33 = vpop.f32.mrb[16].mxu1  ;;  %v2427_v36 = vadd.f32 %v1152_v34, %v3781_v9  ;;  %v1154_v38 = vpop.f32.mrb[18].mxu0 }
 0x28e   : > { %v2490_v35 = vadd.f32 %v1536_v33, %v3779_v8  ;;  %v1538_v37 = vpop.f32.mrb[17].mxu1  ;;  %v2428_v40 = vadd.f32 %v1154_v38, %v3776_v7  ;;  %v1156_v42 = vpop.f32.mrb[19].mxu0 }
 0x28f   : > { %v2491_v39 = vadd.f32 %v1538_v37, %v3783_v10  ;;  %v1540_v41 = vpop.f32.mrb[18].mxu1  ;;  %v2362_v43 = vpack.c.bf16 %v2427_v36, %v2426_v32  ;;  %v2429_v45 = vadd.f32 %v1156_v42, %v3781_v9 }
 0x290   : > { %v2492_v44 = vadd.f32 %v1540_v41, %v3779_v8  ;;  %v1542_v46 = vpop.f32.mrb[19].mxu1 }
 0x291   : > { %v2363_v47 = vpack.c.bf16 %v2491_v39, %v2490_v35  ;;  %v2493_v48 = vadd.f32 %v1542_v46, %v3783_v10  ;;  %2055 = vst [vmem:[%s3795_s20 + $0x80] sm:$0xff] %v2362_v43  ;;  %v2364_v49 = vpack.c.bf16 %v2429_v45, %v2428_v40 }
 0x293   : > { %2056 = vst [vmem:[%s3795_s20 + $0x88] sm:$0xff] %v2363_v47  ;;  %v2365_v50 = vpack.c.bf16 %v2493_v48, %v2492_v44  ;;  %2057 = vst [vmem:[%s3795_s20 + $0x90] sm:$0xff] %v2364_v49  ;;  %v1160_v51 = vpop.f32.mrb[20].mxu0 }
 0x294   : > { %v2430_v52 = vadd.f32 %v1160_v51, %v3776_v7  ;;  %v1162_v54 = vpop.f32.mrb[21].mxu0 }
 0x295   : > { %2058 = vst [vmem:[%s3795_s20 + $0x98] sm:$0xff] %v2365_v50  ;;  %v1546_v53 = vpop.f32.mrb[20].mxu1  ;;  %v2431_v56 = vadd.f32 %v1162_v54, %v3781_v9  ;;  %v1164_v58 = vpop.f32.mrb[22].mxu0 }
 0x296   : > { %v2494_v55 = vadd.f32 %v1546_v53, %v3779_v8  ;;  %v1548_v57 = vpop.f32.mrb[21].mxu1  ;;  %v2432_v60 = vadd.f32 %v1164_v58, %v3776_v7  ;;  %v1166_v62 = vpop.f32.mrb[23].mxu0 }
 0x297   : > { %v2495_v59 = vadd.f32 %v1548_v57, %v3783_v10  ;;  %v1550_v61 = vpop.f32.mrb[22].mxu1  ;;  %v2366_v63 = vpack.c.bf16 %v2431_v56, %v2430_v52  ;;  %v2433_v1 = vadd.f32 %v1166_v62, %v3781_v9 }
 0x298   : > { %v2496_v0 = vadd.f32 %v1550_v61, %v3779_v8  ;;  %v1552_v2 = vpop.f32.mrb[23].mxu1 }
 0x299   : > { %v2367_v3 = vpack.c.bf16 %v2495_v59, %v2494_v55  ;;  %v2497_v4 = vadd.f32 %v1552_v2, %v3783_v10  ;;  %2059 = vst [vmem:[%s3795_s20 + $0xa0] sm:$0xff] %v2366_v63  ;;  %v2368_v5 = vpack.c.bf16 %v2433_v1, %v2432_v60 }
 0x29b   : > { %2060 = vst [vmem:[%s3795_s20 + $0xa8] sm:$0xff] %v2367_v3  ;;  %v2369_v6 = vpack.c.bf16 %v2497_v4, %v2496_v0  ;;  %2061 = vst [vmem:[%s3795_s20 + $0xb0] sm:$0xff] %v2368_v5  ;;  %v1170_v11 = vpop.f32.mrb[24].mxu0 }
 0x29c   : > { %v2434_v12 = vadd.f32 %v1170_v11, %v3776_v7  ;;  %v1172_v14 = vpop.f32.mrb[25].mxu0 }
 0x29d   : > { %2062 = vst [vmem:[%s3795_s20 + $0xb8] sm:$0xff] %v2369_v6  ;;  %v1556_v13 = vpop.f32.mrb[24].mxu1  ;;  %v2435_v16 = vadd.f32 %v1172_v14, %v3781_v9  ;;  %v1174_v18 = vpop.f32.mrb[26].mxu0 }
 0x29e   : > { %v2498_v15 = vadd.f32 %v1556_v13, %v3779_v8  ;;  %v1558_v17 = vpop.f32.mrb[25].mxu1  ;;  %v2436_v20 = vadd.f32 %v1174_v18, %v3776_v7  ;;  %v1176_v22 = vpop.f32.mrb[27].mxu0 }
 0x29f   : > { %v2499_v19 = vadd.f32 %v1558_v17, %v3783_v10  ;;  %v1560_v21 = vpop.f32.mrb[26].mxu1  ;;  %v2370_v23 = vpack.c.bf16 %v2435_v16, %v2434_v12  ;;  %v2437_v25 = vadd.f32 %v1176_v22, %v3781_v9 }
 0x2a0   : > { %v2500_v24 = vadd.f32 %v1560_v21, %v3779_v8  ;;  %v1562_v26 = vpop.f32.mrb[27].mxu1 }
 0x2a1   : > { %v2371_v27 = vpack.c.bf16 %v2499_v19, %v2498_v15  ;;  %v2501_v28 = vadd.f32 %v1562_v26, %v3783_v10  ;;  %2063 = vst [vmem:[%s3795_s20 + $0xc0] sm:$0xff] %v2370_v23  ;;  %v2372_v29 = vpack.c.bf16 %v2437_v25, %v2436_v20 }
 0x2a3   : > { %2064 = vst [vmem:[%s3795_s20 + $0xc8] sm:$0xff] %v2371_v27  ;;  %v2373_v30 = vpack.c.bf16 %v2501_v28, %v2500_v24  ;;  %2065 = vst [vmem:[%s3795_s20 + $0xd0] sm:$0xff] %v2372_v29  ;;  %v1180_v31 = vpop.f32.mrb[28].mxu0 }
 0x2a4   : > { %v2438_v32 = vadd.f32 %v1180_v31, %v3776_v7  ;;  %v1182_v34 = vpop.f32.mrb[29].mxu0 }
 0x2a5   : > { %2066 = vst [vmem:[%s3795_s20 + $0xd8] sm:$0xff] %v2373_v30  ;;  %v1566_v33 = vpop.f32.mrb[28].mxu1  ;;  %v2439_v36 = vadd.f32 %v1182_v34, %v3781_v9  ;;  %v1184_v38 = vpop.f32.mrb[30].mxu0 }
 0x2a6   : > { %v2502_v35 = vadd.f32 %v1566_v33, %v3779_v8  ;;  %v1568_v37 = vpop.f32.mrb[29].mxu1  ;;  %v2440_v40 = vadd.f32 %v1184_v38, %v3776_v7  ;;  %v1186_v42 = vpop.f32.mrb[31].mxu0 }
 0x2a7   : > { %v2503_v39 = vadd.f32 %v1568_v37, %v3783_v10  ;;  %v1570_v41 = vpop.f32.mrb[30].mxu1  ;;  %v2374_v43 = vpack.c.bf16 %v2439_v36, %v2438_v32  ;;  %v2441_v45 = vadd.f32 %v1186_v42, %v3781_v9 }
 0x2a8   : > { %v2504_v44 = vadd.f32 %v1570_v41, %v3779_v8  ;;  %v1572_v46 = vpop.f32.mrb[31].mxu1 }
 0x2a9   : > { %v2375_v47 = vpack.c.bf16 %v2503_v39, %v2502_v35  ;;  %v2505_v48 = vadd.f32 %v1572_v46, %v3783_v10  ;;  %2067 = vst [vmem:[%s3795_s20 + $0xe0] sm:$0xff] %v2374_v43  ;;  %v2376_v49 = vpack.c.bf16 %v2441_v45, %v2440_v40 }
 0x2ab   : > { %2068 = vst [vmem:[%s3795_s20 + $0xe8] sm:$0xff] %v2375_v47  ;;  %v2377_v50 = vpack.c.bf16 %v2505_v48, %v2504_v44  ;;  %2069 = vst [vmem:[%s3795_s20 + $0xf0] sm:$0xff] %v2376_v49  ;;  %v1190_v51 = vpop.f32.mrb[32].mxu0 }
 0x2ac   : > { %v2442_v52 = vadd.f32 %v1190_v51, %v3776_v7  ;;  %v1192_v54 = vpop.f32.mrb[33].mxu0 }
 0x2ad   : > { %2070 = vst [vmem:[%s3795_s20 + $0xf8] sm:$0xff] %v2377_v50  ;;  %v1576_v53 = vpop.f32.mrb[32].mxu1  ;;  %v2443_v56 = vadd.f32 %v1192_v54, %v3781_v9  ;;  %v1194_v58 = vpop.f32.mrb[34].mxu0 }
 0x2ae   : > { %v2506_v55 = vadd.f32 %v1576_v53, %v3779_v8  ;;  %v1578_v57 = vpop.f32.mrb[33].mxu1  ;;  %v2444_v60 = vadd.f32 %v1194_v58, %v3776_v7  ;;  %v1196_v62 = vpop.f32.mrb[35].mxu0 }
 0x2af   : > { %v2507_v59 = vadd.f32 %v1578_v57, %v3783_v10  ;;  %v1580_v61 = vpop.f32.mrb[34].mxu1  ;;  %v2378_v63 = vpack.c.bf16 %v2443_v56, %v2442_v52  ;;  %v2445_v1 = vadd.f32 %v1196_v62, %v3781_v9 }
 0x2b0   : > { %v2508_v0 = vadd.f32 %v1580_v61, %v3779_v8  ;;  %v1582_v2 = vpop.f32.mrb[35].mxu1 }
 0x2b1   : > { %v2379_v3 = vpack.c.bf16 %v2507_v59, %v2506_v55  ;;  %v2509_v4 = vadd.f32 %v1582_v2, %v3783_v10  ;;  %2071 = vst [vmem:[%s3795_s20 + $0x100] sm:$0xff] %v2378_v63  ;;  %v2380_v5 = vpack.c.bf16 %v2445_v1, %v2444_v60 }
 0x2b3   : > { %2072 = vst [vmem:[%s3795_s20 + $0x108] sm:$0xff] %v2379_v3  ;;  %v2381_v6 = vpack.c.bf16 %v2509_v4, %v2508_v0  ;;  %2073 = vst [vmem:[%s3795_s20 + $0x110] sm:$0xff] %v2380_v5  ;;  %v1200_v11 = vpop.f32.mrb[36].mxu0 }
 0x2b4   : > { %v2446_v12 = vadd.f32 %v1200_v11, %v3776_v7  ;;  %v1202_v14 = vpop.f32.mrb[37].mxu0 }
 0x2b5   : > { %2074 = vst [vmem:[%s3795_s20 + $0x118] sm:$0xff] %v2381_v6  ;;  %v1586_v13 = vpop.f32.mrb[36].mxu1  ;;  %v2447_v16 = vadd.f32 %v1202_v14, %v3781_v9  ;;  %v1204_v18 = vpop.f32.mrb[38].mxu0 }
 0x2b6   : > { %v2510_v15 = vadd.f32 %v1586_v13, %v3779_v8  ;;  %v1588_v17 = vpop.f32.mrb[37].mxu1  ;;  %v2448_v20 = vadd.f32 %v1204_v18, %v3776_v7  ;;  %v1206_v22 = vpop.f32.mrb[39].mxu0 }
 0x2b7   : > { %v2511_v19 = vadd.f32 %v1588_v17, %v3783_v10  ;;  %v1590_v21 = vpop.f32.mrb[38].mxu1  ;;  %v2382_v23 = vpack.c.bf16 %v2447_v16, %v2446_v12  ;;  %v2449_v25 = vadd.f32 %v1206_v22, %v3781_v9 }
 0x2b8   : > { %v2512_v24 = vadd.f32 %v1590_v21, %v3779_v8  ;;  %v1592_v26 = vpop.f32.mrb[39].mxu1 }
 0x2b9   : > { %v2383_v27 = vpack.c.bf16 %v2511_v19, %v2510_v15  ;;  %v2513_v28 = vadd.f32 %v1592_v26, %v3783_v10  ;;  %2075 = vst [vmem:[%s3795_s20 + $0x120] sm:$0xff] %v2382_v23  ;;  %v2384_v29 = vpack.c.bf16 %v2449_v25, %v2448_v20 }
 0x2bb   : > { %2076 = vst [vmem:[%s3795_s20 + $0x128] sm:$0xff] %v2383_v27  ;;  %v2385_v30 = vpack.c.bf16 %v2513_v28, %v2512_v24  ;;  %2077 = vst [vmem:[%s3795_s20 + $0x130] sm:$0xff] %v2384_v29  ;;  %v1210_v31 = vpop.f32.mrb[40].mxu0 }
 0x2bc   : > { %v2450_v32 = vadd.f32 %v1210_v31, %v3776_v7  ;;  %v1212_v34 = vpop.f32.mrb[41].mxu0 }
 0x2bd   : > { %2078 = vst [vmem:[%s3795_s20 + $0x138] sm:$0xff] %v2385_v30  ;;  %v1596_v33 = vpop.f32.mrb[40].mxu1  ;;  %v2451_v36 = vadd.f32 %v1212_v34, %v3781_v9  ;;  %v1214_v38 = vpop.f32.mrb[42].mxu0 }
 0x2be   : > { %v2514_v35 = vadd.f32 %v1596_v33, %v3779_v8  ;;  %v1598_v37 = vpop.f32.mrb[41].mxu1  ;;  %v2452_v40 = vadd.f32 %v1214_v38, %v3776_v7  ;;  %v1216_v42 = vpop.f32.mrb[43].mxu0 }
 0x2bf   : > { %v2515_v39 = vadd.f32 %v1598_v37, %v3783_v10  ;;  %v1600_v41 = vpop.f32.mrb[42].mxu1  ;;  %v2386_v43 = vpack.c.bf16 %v2451_v36, %v2450_v32  ;;  %v2453_v45 = vadd.f32 %v1216_v42, %v3781_v9 }
 0x2c0   : > { %v2516_v44 = vadd.f32 %v1600_v41, %v3779_v8  ;;  %v1602_v46 = vpop.f32.mrb[43].mxu1 }
 0x2c1   : > { %v2387_v47 = vpack.c.bf16 %v2515_v39, %v2514_v35  ;;  %v2517_v48 = vadd.f32 %v1602_v46, %v3783_v10  ;;  %2079 = vst [vmem:[%s3795_s20 + $0x140] sm:$0xff] %v2386_v43  ;;  %v2388_v49 = vpack.c.bf16 %v2453_v45, %v2452_v40 }
 0x2c3   : > { %2080 = vst [vmem:[%s3795_s20 + $0x148] sm:$0xff] %v2387_v47  ;;  %v2389_v50 = vpack.c.bf16 %v2517_v48, %v2516_v44  ;;  %2081 = vst [vmem:[%s3795_s20 + $0x150] sm:$0xff] %v2388_v49  ;;  %v1220_v51 = vpop.f32.mrb[44].mxu0 }
 0x2c4   : > { %v2454_v52 = vadd.f32 %v1220_v51, %v3776_v7  ;;  %v1222_v54 = vpop.f32.mrb[45].mxu0 }
 0x2c5   : > { %2082 = vst [vmem:[%s3795_s20 + $0x158] sm:$0xff] %v2389_v50  ;;  %v1606_v53 = vpop.f32.mrb[44].mxu1  ;;  %v2455_v56 = vadd.f32 %v1222_v54, %v3781_v9  ;;  %v1224_v58 = vpop.f32.mrb[46].mxu0 }
 0x2c6   : > { %v2518_v55 = vadd.f32 %v1606_v53, %v3779_v8  ;;  %v1608_v57 = vpop.f32.mrb[45].mxu1  ;;  %v2456_v60 = vadd.f32 %v1224_v58, %v3776_v7  ;;  %v1226_v62 = vpop.f32.mrb[47].mxu0 }
 0x2c7   : > { %v2519_v59 = vadd.f32 %v1608_v57, %v3783_v10  ;;  %v1610_v61 = vpop.f32.mrb[46].mxu1  ;;  %v2390_v63 = vpack.c.bf16 %v2455_v56, %v2454_v52  ;;  %v2457_v1 = vadd.f32 %v1226_v62, %v3781_v9 }
 0x2c8   : > { %v2520_v0 = vadd.f32 %v1610_v61, %v3779_v8  ;;  %v1612_v2 = vpop.f32.mrb[47].mxu1 }
 0x2c9   : > { %v2391_v3 = vpack.c.bf16 %v2519_v59, %v2518_v55  ;;  %v2521_v4 = vadd.f32 %v1612_v2, %v3783_v10  ;;  %2083 = vst [vmem:[%s3795_s20 + $0x160] sm:$0xff] %v2390_v63  ;;  %v2392_v5 = vpack.c.bf16 %v2457_v1, %v2456_v60 }
 0x2cb   : > { %2084 = vst [vmem:[%s3795_s20 + $0x168] sm:$0xff] %v2391_v3  ;;  %v2393_v6 = vpack.c.bf16 %v2521_v4, %v2520_v0  ;;  %2085 = vst [vmem:[%s3795_s20 + $0x170] sm:$0xff] %v2392_v5  ;;  %v1230_v11 = vpop.f32.mrb[48].mxu0 }
 0x2cc   : > { %v2458_v12 = vadd.f32 %v1230_v11, %v3776_v7  ;;  %v1232_v14 = vpop.f32.mrb[49].mxu0 }
 0x2cd   : > { %2086 = vst [vmem:[%s3795_s20 + $0x178] sm:$0xff] %v2393_v6  ;;  %v1616_v13 = vpop.f32.mrb[48].mxu1  ;;  %v2459_v16 = vadd.f32 %v1232_v14, %v3781_v9  ;;  %v1234_v18 = vpop.f32.mrb[50].mxu0 }
 0x2ce   : > { %v2522_v15 = vadd.f32 %v1616_v13, %v3779_v8  ;;  %v1618_v17 = vpop.f32.mrb[49].mxu1  ;;  %v2460_v20 = vadd.f32 %v1234_v18, %v3776_v7  ;;  %v1236_v22 = vpop.f32.mrb[51].mxu0 }
 0x2cf   : > { %v2523_v19 = vadd.f32 %v1618_v17, %v3783_v10  ;;  %v1620_v21 = vpop.f32.mrb[50].mxu1  ;;  %v2394_v23 = vpack.c.bf16 %v2459_v16, %v2458_v12  ;;  %v2461_v25 = vadd.f32 %v1236_v22, %v3781_v9 }
 0x2d0   : > { %v2524_v24 = vadd.f32 %v1620_v21, %v3779_v8  ;;  %v1622_v26 = vpop.f32.mrb[51].mxu1 }
 0x2d1   : > { %v2395_v27 = vpack.c.bf16 %v2523_v19, %v2522_v15  ;;  %v2525_v28 = vadd.f32 %v1622_v26, %v3783_v10  ;;  %2087 = vst [vmem:[%s3795_s20 + $0x180] sm:$0xff] %v2394_v23  ;;  %v2396_v29 = vpack.c.bf16 %v2461_v25, %v2460_v20 }
 0x2d3   : > { %2088 = vst [vmem:[%s3795_s20 + $0x188] sm:$0xff] %v2395_v27  ;;  %v2397_v30 = vpack.c.bf16 %v2525_v28, %v2524_v24  ;;  %2089 = vst [vmem:[%s3795_s20 + $0x190] sm:$0xff] %v2396_v29  ;;  %v1240_v31 = vpop.f32.mrb[52].mxu0 }
 0x2d4   : > { %v2462_v32 = vadd.f32 %v1240_v31, %v3776_v7  ;;  %v1242_v34 = vpop.f32.mrb[53].mxu0 }
 0x2d5   : > { %2090 = vst [vmem:[%s3795_s20 + $0x198] sm:$0xff] %v2397_v30  ;;  %v1626_v33 = vpop.f32.mrb[52].mxu1  ;;  %v2463_v36 = vadd.f32 %v1242_v34, %v3781_v9  ;;  %v1244_v38 = vpop.f32.mrb[54].mxu0 }
 0x2d6   : > { %v2526_v35 = vadd.f32 %v1626_v33, %v3779_v8  ;;  %v1628_v37 = vpop.f32.mrb[53].mxu1  ;;  %v2464_v40 = vadd.f32 %v1244_v38, %v3776_v7  ;;  %v1246_v42 = vpop.f32.mrb[55].mxu0 }
 0x2d7   : > { %v2527_v39 = vadd.f32 %v1628_v37, %v3783_v10  ;;  %v1630_v41 = vpop.f32.mrb[54].mxu1  ;;  %v2398_v43 = vpack.c.bf16 %v2463_v36, %v2462_v32  ;;  %v2465_v45 = vadd.f32 %v1246_v42, %v3781_v9 }
 0x2d8   : > { %v2528_v44 = vadd.f32 %v1630_v41, %v3779_v8  ;;  %v1632_v46 = vpop.f32.mrb[55].mxu1 }
 0x2d9   : > { %v2399_v47 = vpack.c.bf16 %v2527_v39, %v2526_v35  ;;  %v2529_v48 = vadd.f32 %v1632_v46, %v3783_v10  ;;  %2091 = vst [vmem:[%s3795_s20 + $0x1a0] sm:$0xff] %v2398_v43  ;;  %v2400_v49 = vpack.c.bf16 %v2465_v45, %v2464_v40 }
 0x2db   : > { %2092 = vst [vmem:[%s3795_s20 + $0x1a8] sm:$0xff] %v2399_v47  ;;  %v2401_v50 = vpack.c.bf16 %v2529_v48, %v2528_v44  ;;  %2093 = vst [vmem:[%s3795_s20 + $0x1b0] sm:$0xff] %v2400_v49  ;;  %v1250_v51 = vpop.f32.mrb[56].mxu0 }
 0x2dc   : > { %v2466_v52 = vadd.f32 %v1250_v51, %v3776_v7  ;;  %v1252_v54 = vpop.f32.mrb[57].mxu0 }
 0x2dd   : > { %2094 = vst [vmem:[%s3795_s20 + $0x1b8] sm:$0xff] %v2401_v50  ;;  %v1636_v53 = vpop.f32.mrb[56].mxu1  ;;  %v2467_v56 = vadd.f32 %v1252_v54, %v3781_v9  ;;  %v1254_v58 = vpop.f32.mrb[58].mxu0 }
 0x2de   : > { %v2530_v55 = vadd.f32 %v1636_v53, %v3779_v8  ;;  %v1638_v57 = vpop.f32.mrb[57].mxu1  ;;  %v2468_v60 = vadd.f32 %v1254_v58, %v3776_v7  ;;  %v1256_v62 = vpop.f32.mrb[59].mxu0 }
 0x2df   : > { %v2531_v59 = vadd.f32 %v1638_v57, %v3783_v10  ;;  %v1640_v61 = vpop.f32.mrb[58].mxu1  ;;  %v2402_v63 = vpack.c.bf16 %v2467_v56, %v2466_v52  ;;  %v2469_v1 = vadd.f32 %v1256_v62, %v3781_v9 }
 0x2e0   : > { %v2532_v0 = vadd.f32 %v1640_v61, %v3779_v8  ;;  %v1642_v2 = vpop.f32.mrb[59].mxu1 }
 0x2e1   : > { %v2403_v3 = vpack.c.bf16 %v2531_v59, %v2530_v55  ;;  %v2533_v4 = vadd.f32 %v1642_v2, %v3783_v10  ;;  %2095 = vst [vmem:[%s3795_s20 + $0x1c0] sm:$0xff] %v2402_v63  ;;  %v2404_v5 = vpack.c.bf16 %v2469_v1, %v2468_v60 }
 0x2e3   : > { %2096 = vst [vmem:[%s3795_s20 + $0x1c8] sm:$0xff] %v2403_v3  ;;  %v2405_v6 = vpack.c.bf16 %v2533_v4, %v2532_v0  ;;  %2097 = vst [vmem:[%s3795_s20 + $0x1d0] sm:$0xff] %v2404_v5  ;;  %v1260_v11 = vpop.f32.mrb[60].mxu0 }
 0x2e4   : > { %v2470_v12 = vadd.f32 %v1260_v11, %v3776_v7  ;;  %v1262_v14 = vpop.f32.mrb[61].mxu0 }
 0x2e5   : > { %2098 = vst [vmem:[%s3795_s20 + $0x1d8] sm:$0xff] %v2405_v6  ;;  %v1646_v13 = vpop.f32.mrb[60].mxu1  ;;  %v2471_v16 = vadd.f32 %v1262_v14, %v3781_v9  ;;  %v1264_v18 = vpop.f32.mrb[62].mxu0 }
 0x2e6   : > { %v2534_v15 = vadd.f32 %v1646_v13, %v3779_v8  ;;  %v1648_v17 = vpop.f32.mrb[61].mxu1  ;;  %v2472_v20 = vadd.f32 %v1264_v18, %v3776_v7  ;;  %v1266_v22 = vpop.f32.mrb[63].mxu0 }
 0x2e7   : > { %v2535_v19 = vadd.f32 %v1648_v17, %v3783_v10  ;;  %v1650_v21 = vpop.f32.mrb[62].mxu1  ;;  %v2406_v23 = vpack.c.bf16 %v2471_v16, %v2470_v12  ;;  %v2473_v25 = vadd.f32 %v1266_v22, %v3781_v9 }
 0x2e8   : > { %v2536_v24 = vadd.f32 %v1650_v21, %v3779_v8  ;;  %v1652_v26 = vpop.f32.mrb[63].mxu1 }
 0x2e9   : > { %v2407_v27 = vpack.c.bf16 %v2535_v19, %v2534_v15  ;;  %v2537_v28 = vadd.f32 %v1652_v26, %v3783_v10  ;;  %2099 = vst [vmem:[%s3795_s20 + $0x1e0] sm:$0xff] %v2406_v23  ;;  %v2408_v7 = vpack.c.bf16 %v2473_v25, %v2472_v20 }
 0x2eb   : > { %2100 = vst [vmem:[%s3795_s20 + $0x1e8] sm:$0xff] %v2407_v27  ;;  %v2409_v8 = vpack.c.bf16 %v2537_v28, %v2536_v24  ;;  %2101 = vst [vmem:[%s3795_s20 + $0x1f0] sm:$0xff] %v2408_v7 }
 0x2ed   : > { %2102 = vst [vmem:[%s3795_s20 + $0x1f8] sm:$0xff] %v2409_v8 }
 0x2ee   : > { %2911 = shalt.err (!%p2908_p8)
}
 0x2ef   : > { %s2912_s26 = scalar_lea.hbm %s3983_s10, 8192  ;;  %s2916_s20 = scalar_lea.hbm %s4130_s29, 49152 }
 0x2f0   : > { %p2913_p7 = scmp.ne.s32.totalorder %s3983_s10, %s2912_s26  ;;  %p2917_p12 = scmp.lt.u32.totalorder %s3983_s10, %s4130_s29 }
 0x2f1   : > { %p2918_p5 = scmp.lt.u32.totalorder %s2916_s20, %s2912_s26  ;;  %p2920_p6 = scmp.lt.u32.totalorder %s2912_s26, %s3983_s10 }
 0x2f2   : > { %p2914_p2 = pnand %p2913_p7, %p4131_p0 }
 0x2f3   : > { %p2919_p10 = por %p2918_p5, %p2917_p12 }
 0x2f4   : > { %p2915_p9 = pneg %p2914_p2 }
 0x2f5   : > { %p2921_p1 = por %p2920_p6, %p2919_p10 }
 0x2f7   : > { %p2922_p4 = pnand %p2921_p1, %p2915_p9 }
 0x2f9   : > { %2925 = shalt.err (!%p2922_p4)
}
 0x2fa   : > { %s3056_s24 = smov 256   ;;  %s3057_s9 = smov 768  }
 0x2fb   : > { %s3058_s6 = smov 16  }
 0x2fc   : > { %2673 = dma.vmem_to_hbm [thread:$0]  (%p4131_p0), %s3986_s3, 8192, %s3983_s10, %s3993_s11, %s3056_s24, %s3057_s9, %s3058_s6  }
 0x2fd PF: > { %s4132_s18 = sld [smem:[#allocation12_spill]]  ;;  %p2690_p11 = scmp.ge.s32.totalorder %s3048_s25, 2 }
 0x2fe   : > { %p4133_p13 = scmp.ne.s32.totalorder %s4116_s12, 0 }
 0x300   : > { %p2686_p3 = pnand %p2690_p11, %p4133_p13 }
 0x303   : > { %s2135_s15 = sand.u32 1, %s4132_s18  }
 0x304   : > { %s2136_s30 = scalar_lea.sflag [#allocation4], %s2135_s15 }
 0x305   : > { %2991 = dma.done.wait (!%p2686_p3), %s2136_s30, 8192  }
 0x306   : > { %2993 = vsyncadd (!%p2686_p3), %s2136_s30, 4294959104  ;;  %s22_s25 = sadd.s32 1, %s3048_s25   ;;  %s4135_s12 = sld [smem:[#allocation13_spill]] }
 0x307   : > { %p4022_p8 = scmp.ge.s32.totalorder %s22_s25, 8   ;;  %s4136_s7 = sld [smem:[#allocation19_spill]] }
 0x308   : > { %s4137_s3 = sld [smem:[#allocation14_spill]]  ;;  %s4138_s20 = sld [smem:[#allocation21_spill]] }
 0x309   : > { %s4139_s22 = sld [smem:[#allocation17_spill]]  ;;  %s4140_s10 = sld [smem:[#allocation18_spill]] }
 0x30a   : > { %s4141_s24 = sld [smem:[#allocation20_spill]]  ;;  %s4142_s13 = smov %s3004_s14 }
 0x30b   : > { %s4143_s14 = smov %s3284_s1  ;;  %s4144_s15 = smov %s3012_s16 }
 0x30c   : > { %s4145_s16 = smov %s3016_s17  ;;  %s4147_s18 = smov %s3024_s19 }
 0x30d   : > { %s4146_s17 = smov %s4136_s7  ;;  %s4149_s21 = smov %s3040_s23 }
 0x30e   : > { %s4148_s19 = smov %s4137_s3  ;;  %21 = sbr.rel (!%p4022_p8) target bundleno = 15 (0xf), region = 101 }
 0x30f   : > { %s4150_s23 = smov %s4140_s10 }
 0x315   :  { %2141 = vsyncpa [#allocation3], 1 }
 0x316   :  { %2143 = vsyncpa [#allocation3 + $0x1], 1 }
 0x317   :  { %2144 = vsyncpa [#allocation6], 1 }
 0x318   :  { %2146 = vsyncpa [#allocation6 + $0x1], 1 }
 0x319   :  { %2147 = vsyncpa [#allocation4], 1 }
 0x31a   :  { %2149 = vsyncpa [#allocation4 + $0x1], 1 }

</bundles_post_ra>
